<compile_context>
chip_gen: v7x
topology: tpu7x:2x2x1
jax: 0.10.0
libtpu: 0.0.40
codegen_flags: <defaults>
</compile_context>

<pallas_src>
import functools
import math

import jax
import jax.numpy as jnp
from jax import lax
from jax.experimental import pallas as pl
from jax.experimental.pallas import tpu as pltpu

NEAR_INF = 1e20


def _round_up(x, m):
    return ((x + m - 1) // m) * m


def _mha_kernel(n_heads, dph_pad,
                hao_ref, qing_ref, bo_ref, bias_ref,
                wq_ref, bq_ref, wk_ref, bk_ref, wv_ref, bv_ref,
                wo_ref, bo_bias_ref,
                out_ref,
                k_vmem, v_vmem, oh_vmem):
    # hao_ref: (TQ, qdim)    qing_ref: (Lk, kdim)    bo_ref: (Lk, vdim)
    # bias_ref: (1, Lk) f32 additive mask bias (0 or -NEAR_INF)
    # w*_ref: pre-transposed (in, head-padded out), activation dtype;
    #         1/sqrt(dph) already folded into Wq/bq.
    # k_vmem/v_vmem: (Lk, hdim_pad) per-batch projected K/V cache.
    # oh_vmem: (TQ, hdim_pad) head-major concat of per-head attention outputs.
    act_dt = hao_ref.dtype
    tq = hao_ref.shape[0]
    lk = qing_ref.shape[0]

    # --- K/V projection once per batch; reused by every q tile. -------------
    @pl.when(pl.program_id(1) == 0)
    def _():
        k_vmem[...] = (jnp.dot(qing_ref[...], wk_ref[...],
                               preferred_element_type=jnp.float32)
                       + bk_ref[...]).astype(act_dt)
        v_vmem[...] = (jnp.dot(bo_ref[...], wv_ref[...],
                               preferred_element_type=jnp.float32)
                       + bv_ref[...]).astype(act_dt)

    # Q projection for this tile (already pre-scaled by 1/sqrt(dph)).
    q = (jnp.dot(hao_ref[...], wq_ref[...],
                 preferred_element_type=jnp.float32)
         + bq_ref[...]).astype(act_dt)

    # Hoist the (1, Lk) -> (TQ, Lk) mask-bias broadcast out of the head loop.
    bias_b = jnp.broadcast_to(bias_ref[...], (tq, lk))

    # Per-head attention.  dph_pad is a multiple of 128, so every slice below is
    # a lane-aligned free view.
    # TODO(synk): for production n_heads >= 8-16, switch to lax.fori_loop to
    # bound vreg live ranges (demo n_heads=4 -> static unroll).
    for h in range(n_heads):
        lo = h * dph_pad
        hi = lo + dph_pad
        qh = q[:, lo:hi]                                   # (TQ, dph_pad)
        kh = k_vmem[:, lo:hi]                              # (Lk, dph_pad)
        vh = v_vmem[:, lo:hi]                              # (Lk, dph_pad)

        # scores = qh @ kh^T via contraction on the last dims (no materialized
        # k transpose on the hot path).
        scores = lax.dot_general(
            qh, kh, dimension_numbers=(((1,), (1,)), ((), ())),
            preferred_element_type=jnp.float32)            # (TQ, Lk) f32
        scores = scores + bias_b                           # masked_fill(-NEAR_INF)

        # Numerically stable softmax over keys (f32, exact division).
        m = jnp.max(scores, axis=-1, keepdims=True)
        e = jnp.exp(scores - m)
        p = e / jnp.sum(e, axis=-1, keepdims=True)
        # TODO(synk): attn_dropout is identity for p=0 (module default).

        oh = jnp.dot(p.astype(act_dt), vh,
                     preferred_element_type=jnp.float32)   # (TQ, dph_pad)
        oh_vmem[:, lo:hi] = oh.astype(act_dt)              # head-major concat

    # One output projection with contraction K = hdim_pad (good MXU cadence);
    # out_pad is a multiple of 128 -> lane-dense unmasked stores.
    out = (jnp.dot(oh_vmem[...], wo_ref[...],
                   preferred_element_type=jnp.float32)
           + bo_bias_ref[...])
    out_ref[...] = out.astype(out_ref.dtype)


def multi_head_attention(hao, qing, bo, mask, params, n_heads, *, block_q=256):
    """hao: (B, Lq, qdim); qing: (B, Lk, kdim) | None; bo: (B, Lk, vdim) | None;
    mask: (B, Lk) with 1 = attend, 0 = masked.  params in torch.nn.Linear layout."""
    assert mask is not None, "Mask is None, please specify a mask"
    if qing is None and bo is None:
        qing = bo = hao
    elif bo is None:
        bo = qing

    B, Lq, qdim = hao.shape
    _, Lk, kdim = qing.shape
    vdim = bo.shape[-1]
    hdim = params["wq"].shape[0]
    assert hdim % n_heads == 0, (hdim, n_heads)
    dph = hdim // n_heads
    scale = math.sqrt(dph)
    act_dt = hao.dtype

    # ---- Head / lane padding so every per-head slice & store is 128-aligned ---
    dph_pad = _round_up(dph, 128)
    hdim_pad = n_heads * dph_pad
    out_pad = _round_up(hdim, 128)

    def pad_heads_out(w_t, b):
        # w_t: (in, hdim) -> (in, hdim_pad) with per-head zero column padding.
        in_f = w_t.shape[0]
        w3 = w_t.reshape(in_f, n_heads, dph)
        w3 = jnp.pad(w3, ((0, 0), (0, 0), (0, dph_pad - dph)))
        b2 = jnp.pad(b.reshape(n_heads, dph), ((0, 0), (0, dph_pad - dph)))
        return w3.reshape(in_f, hdim_pad), b2.reshape(1, hdim_pad)

    # Pre-transpose to (in, out); fold 1/sqrt(dph) into Wq/bq; per-head pad.
    wq_t, bq = pad_heads_out((params["wq"] / scale).T, params["bq"] / scale)
    wk_t, bk = pad_heads_out(params["wk"].T, params["bk"])
    wv_t, bv = pad_heads_out(params["wv"].T, params["bv"])

    # Wo^T: (hdim_in, hdim_out) -> pad input rows per head, pad output columns.
    wo_t = params["wo"].T.reshape(n_heads, dph, hdim)
    wo_t = jnp.pad(wo_t, ((0, 0), (0, dph_pad - dph), (0, out_pad - hdim)))
    wo_t = wo_t.reshape(hdim_pad, out_pad)
    bo_bias = jnp.pad(params["bo"], (0, out_pad - hdim)).reshape(1, out_pad)

    # Weights in activation dtype (bf16 activations -> native bf16 MXU passes);
    # biases stay f32 (added after the f32 accumulation, negligible footprint).
    wq_t = wq_t.astype(act_dt)
    wk_t = wk_t.astype(act_dt)
    wv_t = wv_t.astype(act_dt)
    wo_t = wo_t.astype(act_dt)
    bq = bq.astype(jnp.float32)
    bk = bk.astype(jnp.float32)
    bv = bv.astype(jnp.float32)
    bo_bias = bo_bias.astype(jnp.float32)

    # Additive mask bias (0 / -NEAR_INF), computed once outside the kernel.
    mask_bias = jnp.where(mask == 0, jnp.float32(-NEAR_INF),
                          jnp.float32(0.0)).reshape(B, 1, Lk)

    # q tiling: full Lq when small, else a capped tile; ragged tail handled by
    # a cdiv grid (Pallas masks out-of-range rows).
    block_q = Lq if Lq <= block_q else block_q
    n_q = pl.cdiv(Lq, block_q)

    kernel = functools.partial(_mha_kernel, n_heads, dph_pad)

    def const2d(shape):
        # Grid-invariant operand (weights/biases), full block.
        return pl.BlockSpec(shape, lambda b, t: (0, 0))

    # VMEM budget from actual buffer arithmetic (double-buffered inputs/outputs,
    # scratch, score temporaries) with headroom; clamped for v7x's 64 MiB.
    isz = jnp.dtype(act_dt).itemsize
    vmem_bytes = (
        2 * block_q * qdim * isz                       # hao
        + 2 * Lk * kdim * isz + 2 * Lk * vdim * isz    # qing, bo
        + 2 * Lk * 4                                   # mask bias
        + 2 * (qdim + kdim + vdim) * hdim_pad * isz    # Wq/Wk/Wv
        + 2 * hdim_pad * out_pad * isz                 # Wo
        + 2 * (3 * hdim_pad + out_pad) * 4             # biases
        + 2 * block_q * out_pad * isz                  # out
        + 2 * Lk * hdim_pad * isz                      # K/V scratch
        + block_q * hdim_pad * isz                     # head-concat scratch
        + 4 * block_q * Lk * 4                         # score/softmax temporaries
    )
    vmem_limit = min(max(int(vmem_bytes * 1.5) + (1 << 20), 4 << 20), 56 << 20)

    out = pl.pallas_call(
        kernel,
        out_shape=jax.ShapeDtypeStruct((B, Lq, out_pad), act_dt),
        grid_spec=pltpu.PrefetchScalarGridSpec(
            num_scalar_prefetch=0,
            grid=(B, n_q),
            in_specs=[
                pl.BlockSpec((pl.Squeezed(), block_q, qdim),
                             lambda b, t: (b, t, 0)),                 # hao
                pl.BlockSpec((pl.Squeezed(), Lk, kdim),
                             lambda b, t: (b, 0, 0)),                 # qing (1 fetch/batch)
                pl.BlockSpec((pl.Squeezed(), Lk, vdim),
                             lambda b, t: (b, 0, 0)),                 # bo   (1 fetch/batch)
                pl.BlockSpec((pl.Squeezed(), 1, Lk),
                             lambda b, t: (b, 0, 0)),                 # mask bias
                const2d((qdim, hdim_pad)),                            # Wq^T (pre-scaled)
                const2d((1, hdim_pad)),                               # bq   (pre-scaled)
                const2d((kdim, hdim_pad)),                            # Wk^T
                const2d((1, hdim_pad)),                               # bk
                const2d((vdim, hdim_pad)),                            # Wv^T
                const2d((1, hdim_pad)),                               # bv
                const2d((hdim_pad, out_pad)),                         # Wo^T
                const2d((1, out_pad)),                                # bo bias
            ],
            out_specs=pl.BlockSpec((pl.Squeezed(), block_q, out_pad),
                                   lambda b, t: (b, t, 0)),
            scratch_shapes=[
                pltpu.VMEM((Lk, hdim_pad), act_dt),        # K cache (per batch)
                pltpu.VMEM((Lk, hdim_pad), act_dt),        # V cache (per batch)
                pltpu.VMEM((block_q, hdim_pad), act_dt),   # head-concat scratch
            ]),
        compiler_params=pltpu.CompilerParams(
            # batch: megacore-parallel; q axis: "arbitrary" so the per-batch
            # K/V scratch init at t == 0 is valid (v7x dual-core relies on B>=2).
            dimension_semantics=("parallel", "arbitrary"),
            vmem_limit_bytes=vmem_limit),
    )(hao, qing, bo, mask_bias,
      wq_t, bq, wk_t, bk, wv_t, bv, wo_t, bo_bias)

    out = out[..., :hdim]            # drop lane padding
    if out.shape[1] == 1:            # PyTorch's .squeeze(1)
        out = jnp.squeeze(out, axis=1)
    return out


def _reference(hao, qing, bo, mask, params, n_heads):
    """Pure-JAX reference mirroring the PyTorch forward."""
    B, Lq, _ = hao.shape
    _, Lk, _ = qing.shape
    hdim = params["wq"].shape[0]
    dph = hdim // n_heads
    scale = math.sqrt(dph)

    def lin(x, w, b):
        return x @ w.T + b

    def heads(t):
        b_, L, _ = t.shape
        return t.reshape(b_, L, n_heads, dph).transpose(0, 2, 1, 3).reshape(
            b_ * n_heads, L, dph)

    q = heads(lin(hao, params["wq"], params["bq"])) / scale
    k = heads(lin(qing, params["wk"], params["bk"]))
    v = heads(lin(bo, params["wv"], params["bv"]))

    dot = jnp.einsum("bqd,bkd->bqk", q, k)
    amask = (mask == 0).reshape(B, 1, 1, Lk)
    amask = jnp.broadcast_to(amask, (B, n_heads, Lq, Lk)).reshape(B * n_heads, Lq, Lk)
    dot = jnp.where(amask, -NEAR_INF, dot)
    w = jax.nn.softmax(dot, axis=-1)
    att = jnp.einsum("bqk,bkd->bqd", w, v)
    att = att.reshape(B, n_heads, Lq, dph).transpose(0, 2, 1, 3).reshape(B, Lq, hdim)
    out = lin(att, params["wo"], params["bo"])
    if out.shape[1] == 1:
        out = jnp.squeeze(out, axis=1)
    return out


def init_params(key, n_heads, qdim, kdim, vdim, hdim):
    """Deterministic synthetic init (xavier-normal weights, small uniform biases)."""
    ks = jax.random.split(key, 8)

    def xavier(k, out_f, in_f):
        std = math.sqrt(2.0 / (in_f + out_f))
        return jax.random.normal(k, (out_f, in_f), jnp.float32) * std

    def bias(k, in_f, out_f):
        bound = 1.0 / math.sqrt(in_f)
        return jax.random.uniform(k, (out_f,), jnp.float32, -bound, bound)

    return {
        "wq": xavier(ks[0], hdim, qdim), "bq": bias(ks[1], qdim, hdim),
        "wk": xavier(ks[2], hdim, kdim), "bk": bias(ks[3], kdim, hdim),
        "wv": xavier(ks[4], hdim, vdim), "bv": bias(ks[5], vdim, hdim),
        "wo": xavier(ks[6], hdim, hdim), "bo": bias(ks[7], hdim, hdim),
    }


if __name__ == "__main__":
    key = jax.random.PRNGKey(0)
    n_heads = 4
    qdim = kdim = vdim = 32
    hdim = 32
    B, Lq, Lk = 2, 8, 8

    k1, k2, k3, k4 = jax.random.split(key, 4)
    hao = jax.random.normal(k1, (B, Lq, qdim), jnp.float32)
    qing = jax.random.normal(k2, (B, Lk, kdim), jnp.float32)
    bo = jax.random.normal(k3, (B, Lk, vdim), jnp.float32)
    # mask: 1 = keep, 0 = masked (pad).
    lens = jnp.array([Lk, Lk - 3], dtype=jnp.int32)
    mask = (jnp.arange(Lk)[None, :] < lens[:, None]).astype(jnp.int32)

    params = init_params(k4, n_heads, qdim, kdim, vdim, hdim)

    out = multi_head_attention(hao, qing, bo, mask, params, n_heads)
    out = jax.block_until_ready(out)

    ref = _reference(hao, qing, bo, mask, params, n_heads)
    assert out.shape == ref.shape, (out.shape, ref.shape)
    # Softmax now uses exact division; tolerance kept conservative to cover
    # f32-on-MXU multi-pass rounding differences vs. the XLA reference path.
    assert jnp.allclose(out, ref, atol=5e-3, rtol=5e-3), \
        float(jnp.max(jnp.abs(out - ref)))

    print("KERNEL_OK")
</pallas_src>

<mosaic_0001>
module attributes {stable_mosaic.version = 11 : i64} {
  func.func @_mha_kernel(%arg0: i32, %arg1: i32, %arg2: memref<1x8x32xf32, #tpu.memory_space<vmem>>, %arg3: memref<1x8x32xf32, #tpu.memory_space<vmem>>, %arg4: memref<1x8x32xf32, #tpu.memory_space<vmem>>, %arg5: memref<1x1x8xf32, #tpu.memory_space<vmem>>, %arg6: memref<32x512xf32, #tpu.memory_space<vmem>>, %arg7: memref<1x512xf32, #tpu.memory_space<vmem>>, %arg8: memref<32x512xf32, #tpu.memory_space<vmem>>, %arg9: memref<1x512xf32, #tpu.memory_space<vmem>>, %arg10: memref<32x512xf32, #tpu.memory_space<vmem>>, %arg11: memref<1x512xf32, #tpu.memory_space<vmem>>, %arg12: memref<512x128xf32, #tpu.memory_space<vmem>>, %arg13: memref<1x128xf32, #tpu.memory_space<vmem>>, %arg14: memref<1x8x128xf32, #tpu.memory_space<vmem>>, %arg15: memref<8x512xf32, #tpu.memory_space<vmem>>, %arg16: memref<8x512xf32, #tpu.memory_space<vmem>>, %arg17: memref<8x512xf32, #tpu.memory_space<vmem>>) attributes {dimension_semantics = [#tpu.dimension_semantics<parallel>, #tpu.dimension_semantics<arbitrary>], iteration_bounds = array<i64: 2, 1>, scalar_prefetch = 0 : i64, scratch_operands = 3 : i64, tpu.core_type = #tpu.core_type<tc>, window_params = [{transform_indices = @transform_0, window_bounds = array<i64: 1, 8, 32>}, {transform_indices = @transform_1, window_bounds = array<i64: 1, 8, 32>}, {transform_indices = @transform_2, window_bounds = array<i64: 1, 8, 32>}, {transform_indices = @transform_3, window_bounds = array<i64: 1, 1, 8>}, {pipeline_mode = #tpu.pipeline_mode<synchronous>, transform_indices = @transform_4, window_bounds = array<i64: 32, 512>}, {pipeline_mode = #tpu.pipeline_mode<synchronous>, transform_indices = @transform_5, window_bounds = array<i64: 1, 512>}, {pipeline_mode = #tpu.pipeline_mode<synchronous>, transform_indices = @transform_6, window_bounds = array<i64: 32, 512>}, {pipeline_mode = #tpu.pipeline_mode<synchronous>, transform_indices = @transform_7, window_bounds = array<i64: 1, 512>}, {pipeline_mode = #tpu.pipeline_mode<synchronous>, transform_indices = @transform_8, window_bounds = array<i64: 32, 512>}, {pipeline_mode = #tpu.pipeline_mode<synchronous>, transform_indices = @transform_9, window_bounds = array<i64: 1, 512>}, {pipeline_mode = #tpu.pipeline_mode<synchronous>, transform_indices = @transform_10, window_bounds = array<i64: 512, 128>}, {pipeline_mode = #tpu.pipeline_mode<synchronous>, transform_indices = @transform_11, window_bounds = array<i64: 1, 128>}, {transform_indices = @transform_12, window_bounds = array<i64: 1, 8, 128>}]} {
    %c0_i32 = arith.constant 0 : i32
    %0 = arith.cmpi eq, %arg1, %c0_i32 : i32
    %1 = arith.extui %0 : i1 to i32
    %c0_i32_0 = arith.constant 0 : i32
    %2 = arith.cmpi ne, %1, %c0_i32_0 : i32
    scf.if %2 {
      %c0_57 = arith.constant 0 : index
      %c0_58 = arith.constant 0 : index
      %c0_59 = arith.constant 0 : index
      %87 = vector.load %arg3[%c0_57, %c0_58, %c0_59] : memref<1x8x32xf32, #tpu.memory_space<vmem>>, vector<1x8x32xf32>
      %88 = vector.shape_cast %87 : vector<1x8x32xf32> to vector<8x32xf32>
      %c0_60 = arith.constant 0 : index
      %c0_61 = arith.constant 0 : index
      %89 = vector.load %arg8[%c0_60, %c0_61] : memref<32x512xf32, #tpu.memory_space<vmem>>, vector<32x512xf32>
      %cst_62 = arith.constant dense<0.000000e+00> : vector<8x512xf32>
      %90 = tpu.matmul %88, %89, %cst_62 {dimension_numbers = #tpu.dot_dimension_numbers<[1], [0], [0], [1], [0, 0, 1, 1], [], []>} : vector<8x32xf32>, vector<32x512xf32>, vector<8x512xf32> -> vector<8x512xf32>
      %c0_63 = arith.constant 0 : index
      %c0_64 = arith.constant 0 : index
      %91 = vector.load %arg9[%c0_63, %c0_64] : memref<1x512xf32, #tpu.memory_space<vmem>>, vector<1x512xf32>
      %92 = vector.broadcast %91 : vector<1x512xf32> to vector<8x512xf32>
      %93 = arith.addf %90, %92 : vector<8x512xf32>
      %c0_65 = arith.constant 0 : index
      %c0_66 = arith.constant 0 : index
      %94 = vector.load %arg15[%c0_65, %c0_66] : memref<8x512xf32, #tpu.memory_space<vmem>>, vector<8x512xf32>
      tpu.vector_store %arg15[%c0_65, %c0_66], %93 {strides = array<i32>} : memref<8x512xf32, #tpu.memory_space<vmem>>, vector<8x512xf32>,
      %c0_67 = arith.constant 0 : index
      %c0_68 = arith.constant 0 : index
      %c0_69 = arith.constant 0 : index
      %95 = vector.load %arg4[%c0_67, %c0_68, %c0_69] : memref<1x8x32xf32, #tpu.memory_space<vmem>>, vector<1x8x32xf32>
      %96 = vector.shape_cast %95 : vector<1x8x32xf32> to vector<8x32xf32>
      %c0_70 = arith.constant 0 : index
      %c0_71 = arith.constant 0 : index
      %97 = vector.load %arg10[%c0_70, %c0_71] : memref<32x512xf32, #tpu.memory_space<vmem>>, vector<32x512xf32>
      %cst_72 = arith.constant dense<0.000000e+00> : vector<8x512xf32>
      %98 = tpu.matmul %96, %97, %cst_72 {dimension_numbers = #tpu.dot_dimension_numbers<[1], [0], [0], [1], [0, 0, 1, 1], [], []>} : vector<8x32xf32>, vector<32x512xf32>, vector<8x512xf32> -> vector<8x512xf32>
      %c0_73 = arith.constant 0 : index
      %c0_74 = arith.constant 0 : index
      %99 = vector.load %arg11[%c0_73, %c0_74] : memref<1x512xf32, #tpu.memory_space<vmem>>, vector<1x512xf32>
      %100 = vector.broadcast %99 : vector<1x512xf32> to vector<8x512xf32>
      %101 = arith.addf %98, %100 : vector<8x512xf32>
      %c0_75 = arith.constant 0 : index
      %c0_76 = arith.constant 0 : index
      %102 = vector.load %arg16[%c0_75, %c0_76] : memref<8x512xf32, #tpu.memory_space<vmem>>, vector<8x512xf32>
      tpu.vector_store %arg16[%c0_75, %c0_76], %101 {strides = array<i32>} : memref<8x512xf32, #tpu.memory_space<vmem>>, vector<8x512xf32>,
    } else {
    }
    %c0 = arith.constant 0 : index
    %c0_1 = arith.constant 0 : index
    %c0_2 = arith.constant 0 : index
    %3 = vector.load %arg2[%c0, %c0_1, %c0_2] : memref<1x8x32xf32, #tpu.memory_space<vmem>>, vector<1x8x32xf32>
    %4 = vector.shape_cast %3 : vector<1x8x32xf32> to vector<8x32xf32>
    %c0_3 = arith.constant 0 : index
    %c0_4 = arith.constant 0 : index
    %5 = vector.load %arg6[%c0_3, %c0_4] : memref<32x512xf32, #tpu.memory_space<vmem>>, vector<32x512xf32>
    %cst = arith.constant dense<0.000000e+00> : vector<8x512xf32>
    %6 = tpu.matmul %4, %5, %cst {dimension_numbers = #tpu.dot_dimension_numbers<[1], [0], [0], [1], [0, 0, 1, 1], [], []>} : vector<8x32xf32>, vector<32x512xf32>, vector<8x512xf32> -> vector<8x512xf32>
    %c0_5 = arith.constant 0 : index
    %c0_6 = arith.constant 0 : index
    %7 = vector.load %arg7[%c0_5, %c0_6] : memref<1x512xf32, #tpu.memory_space<vmem>>, vector<1x512xf32>
    %8 = vector.broadcast %7 : vector<1x512xf32> to vector<8x512xf32>
    %9 = arith.addf %6, %8 : vector<8x512xf32>
    %c0_7 = arith.constant 0 : index
    %c0_8 = arith.constant 0 : index
    %c0_9 = arith.constant 0 : index
    %10 = vector.load %arg5[%c0_7, %c0_8, %c0_9] : memref<1x1x8xf32, #tpu.memory_space<vmem>>, vector<1x1x8xf32>
    %11 = vector.shape_cast %10 : vector<1x1x8xf32> to vector<1x8xf32>
    %12 = vector.shape_cast %11 : vector<1x8xf32> to vector<1x8xf32>
    %13 = vector.broadcast %12 : vector<1x8xf32> to vector<8x8xf32>
    %14 = vector.extract_strided_slice %9 {offsets = [0, 0], sizes = [8, 128], strides = [1, 1]} : vector<8x512xf32> to vector<8x128xf32>
    %c0_10 = arith.constant 0 : index
    %c0_11 = arith.constant 0 : index
    %15 = vector.load %arg15[%c0_10, %c0_11] : memref<8x512xf32, #tpu.memory_space<vmem>>, vector<8x128xf32>
    %c0_12 = arith.constant 0 : index
    %c0_13 = arith.constant 0 : index
    %16 = vector.load %arg16[%c0_12, %c0_13] : memref<8x512xf32, #tpu.memory_space<vmem>>, vector<8x128xf32>
    %cst_14 = arith.constant dense<0.000000e+00> : vector<8x8xf32>
    %17 = tpu.matmul %14, %15, %cst_14 {dimension_numbers = #tpu.dot_dimension_numbers<[1], [1], [0], [0], [0, 0, 1, 0], [], []>} : vector<8x128xf32>, vector<8x128xf32>, vector<8x8xf32> -> vector<8x8xf32>
    %18 = arith.addf %17, %13 : vector<8x8xf32>
    %cst_15 = arith.constant dense<0xFF800000> : vector<8xf32>
    %19 = vector.multi_reduction <maximumf>, %18, %cst_15 [1] : vector<8x8xf32> to vector<8xf32>
    %20 = vector.shape_cast %19 : vector<8xf32> to vector<8x1xf32>
    %21 = vector.broadcast %20 : vector<8x1xf32> to vector<8x8xf32>
    %22 = arith.subf %18, %21 : vector<8x8xf32>
    %23 = math.exp %22 : vector<8x8xf32>
    %cst_16 = arith.constant dense<0.000000e+00> : vector<8xf32>
    %24 = vector.multi_reduction <add>, %23, %cst_16 [1] : vector<8x8xf32> to vector<8xf32>
    %25 = vector.shape_cast %24 : vector<8xf32> to vector<8x1xf32>
    %26 = vector.broadcast %25 : vector<8x1xf32> to vector<8x8xf32>
    %27 = arith.divf %23, %26 : vector<8x8xf32>
    %cst_17 = arith.constant dense<0.000000e+00> : vector<8x128xf32>
    %28 = tpu.matmul %27, %16, %cst_17 {dimension_numbers = #tpu.dot_dimension_numbers<[1], [0], [0], [1], [0, 0, 1, 1], [], []>} : vector<8x8xf32>, vector<8x128xf32>, vector<8x128xf32> -> vector<8x128xf32>
    %c0_18 = arith.constant 0 : index
    %c0_19 = arith.constant 0 : index
    %29 = vector.load %arg17[%c0_18, %c0_19] : memref<8x512xf32, #tpu.memory_space<vmem>>, vector<8x128xf32>
    tpu.vector_store %arg17[%c0_18, %c0_19], %28 {strides = array<i32>} : memref<8x512xf32, #tpu.memory_space<vmem>>, vector<8x128xf32>,
    %30 = vector.extract_strided_slice %9 {offsets = [0, 128], sizes = [8, 128], strides = [1, 1]} : vector<8x512xf32> to vector<8x128xf32>
    %c0_20 = arith.constant 0 : index
    %c128 = arith.constant 128 : index
    %31 = vector.load %arg15[%c0_20, %c128] : memref<8x512xf32, #tpu.memory_space<vmem>>, vector<8x128xf32>
    %c0_21 = arith.constant 0 : index
    %c128_22 = arith.constant 128 : index
    %32 = vector.load %arg16[%c0_21, %c128_22] : memref<8x512xf32, #tpu.memory_space<vmem>>, vector<8x128xf32>
    %cst_23 = arith.constant dense<0.000000e+00> : vector<8x8xf32>
    %33 = tpu.matmul %30, %31, %cst_23 {dimension_numbers = #tpu.dot_dimension_numbers<[1], [1], [0], [0], [0, 0, 1, 0], [], []>} : vector<8x128xf32>, vector<8x128xf32>, vector<8x8xf32> -> vector<8x8xf32>
    %34 = arith.addf %33, %13 : vector<8x8xf32>
    %cst_24 = arith.constant dense<0xFF800000> : vector<8xf32>
    %35 = vector.multi_reduction <maximumf>, %34, %cst_24 [1] : vector<8x8xf32> to vector<8xf32>
    %36 = vector.shape_cast %35 : vector<8xf32> to vector<8x1xf32>
    %37 = vector.broadcast %36 : vector<8x1xf32> to vector<8x8xf32>
    %38 = arith.subf %34, %37 : vector<8x8xf32>
    %39 = math.exp %38 : vector<8x8xf32>
    %cst_25 = arith.constant dense<0.000000e+00> : vector<8xf32>
    %40 = vector.multi_reduction <add>, %39, %cst_25 [1] : vector<8x8xf32> to vector<8xf32>
    %41 = vector.shape_cast %40 : vector<8xf32> to vector<8x1xf32>
    %42 = vector.broadcast %41 : vector<8x1xf32> to vector<8x8xf32>
    %43 = arith.divf %39, %42 : vector<8x8xf32>
    %cst_26 = arith.constant dense<0.000000e+00> : vector<8x128xf32>
    %44 = tpu.matmul %43, %32, %cst_26 {dimension_numbers = #tpu.dot_dimension_numbers<[1], [0], [0], [1], [0, 0, 1, 1], [], []>} : vector<8x8xf32>, vector<8x128xf32>, vector<8x128xf32> -> vector<8x128xf32>
    %c0_27 = arith.constant 0 : index
    %c128_28 = arith.constant 128 : index
    %45 = vector.load %arg17[%c0_27, %c128_28] : memref<8x512xf32, #tpu.memory_space<vmem>>, vector<8x128xf32>
    tpu.vector_store %arg17[%c0_27, %c128_28], %44 {strides = array<i32>} : memref<8x512xf32, #tpu.memory_space<vmem>>, vector<8x128xf32>,
    %46 = vector.extract_strided_slice %9 {offsets = [0, 256], sizes = [8, 128], strides = [1, 1]} : vector<8x512xf32> to vector<8x128xf32>
    %c0_29 = arith.constant 0 : index
    %c256 = arith.constant 256 : index
    %47 = vector.load %arg15[%c0_29, %c256] : memref<8x512xf32, #tpu.memory_space<vmem>>, vector<8x128xf32>
    %c0_30 = arith.constant 0 : index
    %c256_31 = arith.constant 256 : index
    %48 = vector.load %arg16[%c0_30, %c256_31] : memref<8x512xf32, #tpu.memory_space<vmem>>, vector<8x128xf32>
    %cst_32 = arith.constant dense<0.000000e+00> : vector<8x8xf32>
    %49 = tpu.matmul %46, %47, %cst_32 {dimension_numbers = #tpu.dot_dimension_numbers<[1], [1], [0], [0], [0, 0, 1, 0], [], []>} : vector<8x128xf32>, vector<8x128xf32>, vector<8x8xf32> -> vector<8x8xf32>
    %50 = arith.addf %49, %13 : vector<8x8xf32>
    %cst_33 = arith.constant dense<0xFF800000> : vector<8xf32>
    %51 = vector.multi_reduction <maximumf>, %50, %cst_33 [1] : vector<8x8xf32> to vector<8xf32>
    %52 = vector.shape_cast %51 : vector<8xf32> to vector<8x1xf32>
    %53 = vector.broadcast %52 : vector<8x1xf32> to vector<8x8xf32>
    %54 = arith.subf %50, %53 : vector<8x8xf32>
    %55 = math.exp %54 : vector<8x8xf32>
    %cst_34 = arith.constant dense<0.000000e+00> : vector<8xf32>
    %56 = vector.multi_reduction <add>, %55, %cst_34 [1] : vector<8x8xf32> to vector<8xf32>
    %57 = vector.shape_cast %56 : vector<8xf32> to vector<8x1xf32>
    %58 = vector.broadcast %57 : vector<8x1xf32> to vector<8x8xf32>
    %59 = arith.divf %55, %58 : vector<8x8xf32>
    %cst_35 = arith.constant dense<0.000000e+00> : vector<8x128xf32>
    %60 = tpu.matmul %59, %48, %cst_35 {dimension_numbers = #tpu.dot_dimension_numbers<[1], [0], [0], [1], [0, 0, 1, 1], [], []>} : vector<8x8xf32>, vector<8x128xf32>, vector<8x128xf32> -> vector<8x128xf32>
    %c0_36 = arith.constant 0 : index
    %c256_37 = arith.constant 256 : index
    %61 = vector.load %arg17[%c0_36, %c256_37] : memref<8x512xf32, #tpu.memory_space<vmem>>, vector<8x128xf32>
    tpu.vector_store %arg17[%c0_36, %c256_37], %60 {strides = array<i32>} : memref<8x512xf32, #tpu.memory_space<vmem>>, vector<8x128xf32>,
    %62 = vector.extract_strided_slice %9 {offsets = [0, 384], sizes = [8, 128], strides = [1, 1]} : vector<8x512xf32> to vector<8x128xf32>
    %c0_38 = arith.constant 0 : index
    %c384 = arith.constant 384 : index
    %63 = vector.load %arg15[%c0_38, %c384] : memref<8x512xf32, #tpu.memory_space<vmem>>, vector<8x128xf32>
    %c0_39 = arith.constant 0 : index
    %c384_40 = arith.constant 384 : index
    %64 = vector.load %arg16[%c0_39, %c384_40] : memref<8x512xf32, #tpu.memory_space<vmem>>, vector<8x128xf32>
    %cst_41 = arith.constant dense<0.000000e+00> : vector<8x8xf32>
    %65 = tpu.matmul %62, %63, %cst_41 {dimension_numbers = #tpu.dot_dimension_numbers<[1], [1], [0], [0], [0, 0, 1, 0], [], []>} : vector<8x128xf32>, vector<8x128xf32>, vector<8x8xf32> -> vector<8x8xf32>
    %66 = arith.addf %65, %13 : vector<8x8xf32>
    %cst_42 = arith.constant dense<0xFF800000> : vector<8xf32>
    %67 = vector.multi_reduction <maximumf>, %66, %cst_42 [1] : vector<8x8xf32> to vector<8xf32>
    %68 = vector.shape_cast %67 : vector<8xf32> to vector<8x1xf32>
    %69 = vector.broadcast %68 : vector<8x1xf32> to vector<8x8xf32>
    %70 = arith.subf %66, %69 : vector<8x8xf32>
    %71 = math.exp %70 : vector<8x8xf32>
    %cst_43 = arith.constant dense<0.000000e+00> : vector<8xf32>
    %72 = vector.multi_reduction <add>, %71, %cst_43 [1] : vector<8x8xf32> to vector<8xf32>
    %73 = vector.shape_cast %72 : vector<8xf32> to vector<8x1xf32>
    %74 = vector.broadcast %73 : vector<8x1xf32> to vector<8x8xf32>
    %75 = arith.divf %71, %74 : vector<8x8xf32>
    %cst_44 = arith.constant dense<0.000000e+00> : vector<8x128xf32>
    %76 = tpu.matmul %75, %64, %cst_44 {dimension_numbers = #tpu.dot_dimension_numbers<[1], [0], [0], [1], [0, 0, 1, 1], [], []>} : vector<8x8xf32>, vector<8x128xf32>, vector<8x128xf32> -> vector<8x128xf32>
    %c0_45 = arith.constant 0 : index
    %c384_46 = arith.constant 384 : index
    %77 = vector.load %arg17[%c0_45, %c384_46] : memref<8x512xf32, #tpu.memory_space<vmem>>, vector<8x128xf32>
    tpu.vector_store %arg17[%c0_45, %c384_46], %76 {strides = array<i32>} : memref<8x512xf32, #tpu.memory_space<vmem>>, vector<8x128xf32>,
    %c0_47 = arith.constant 0 : index
    %c0_48 = arith.constant 0 : index
    %78 = vector.load %arg17[%c0_47, %c0_48] : memref<8x512xf32, #tpu.memory_space<vmem>>, vector<8x512xf32>
    %c0_49 = arith.constant 0 : index
    %c0_50 = arith.constant 0 : index
    %79 = vector.load %arg12[%c0_49, %c0_50] : memref<512x128xf32, #tpu.memory_space<vmem>>, vector<512x128xf32>
    %cst_51 = arith.constant dense<0.000000e+00> : vector<8x128xf32>
    %80 = tpu.matmul %78, %79, %cst_51 {dimension_numbers = #tpu.dot_dimension_numbers<[1], [0], [0], [1], [0, 0, 1, 1], [], []>} : vector<8x512xf32>, vector<512x128xf32>, vector<8x128xf32> -> vector<8x128xf32>
    %c0_52 = arith.constant 0 : index
    %c0_53 = arith.constant 0 : index
    %81 = vector.load %arg13[%c0_52, %c0_53] : memref<1x128xf32, #tpu.memory_space<vmem>>, vector<1x128xf32>
    %82 = vector.broadcast %81 : vector<1x128xf32> to vector<8x128xf32>
    %83 = arith.addf %80, %82 : vector<8x128xf32>
    %c0_54 = arith.constant 0 : index
    %c0_55 = arith.constant 0 : index
    %c0_56 = arith.constant 0 : index
    %84 = vector.load %arg14[%c0_54, %c0_55, %c0_56] : memref<1x8x128xf32, #tpu.memory_space<vmem>>, vector<1x8x128xf32>
    %85 = vector.shape_cast %84 : vector<1x8x128xf32> to vector<8x128xf32>
    %86 = vector.shape_cast %83 : vector<8x128xf32> to vector<1x8x128xf32>
    tpu.vector_store %arg14[%c0_54, %c0_55, %c0_56], %86 {strides = array<i32>} : memref<1x8x128xf32, #tpu.memory_space<vmem>>, vector<1x8x128xf32>,
    return
  }
  func.func @transform_0(%arg0: i32, %arg1: i32) -> (i32, i32, i32) {
    %c0_i32 = arith.constant 0 : i32
    %c0_i32_0 = arith.constant 0 : i32
    return %arg0, %arg1, %c0_i32 : i32, i32, i32
  }
  func.func @transform_1(%arg0: i32, %arg1: i32) -> (i32, i32, i32) {
    %c0_i32 = arith.constant 0 : i32
    %c0_i32_0 = arith.constant 0 : i32
    %c0_i32_1 = arith.constant 0 : i32
    return %arg0, %c0_i32, %c0_i32_0 : i32, i32, i32
  }
  func.func @transform_2(%arg0: i32, %arg1: i32) -> (i32, i32, i32) {
    %c0_i32 = arith.constant 0 : i32
    %c0_i32_0 = arith.constant 0 : i32
    %c0_i32_1 = arith.constant 0 : i32
    return %arg0, %c0_i32, %c0_i32_0 : i32, i32, i32
  }
  func.func @transform_3(%arg0: i32, %arg1: i32) -> (i32, i32, i32) {
    %c0_i32 = arith.constant 0 : i32
    %c0_i32_0 = arith.constant 0 : i32
    %c0_i32_1 = arith.constant 0 : i32
    return %arg0, %c0_i32, %c0_i32_0 : i32, i32, i32
  }
  func.func @transform_4(%arg0: i32, %arg1: i32) -> (i32, i32) {
    %c0_i32 = arith.constant 0 : i32
    %c0_i32_0 = arith.constant 0 : i32
    %c0_i32_1 = arith.constant 0 : i32
    return %c0_i32, %c0_i32_0 : i32, i32
  }
  func.func @transform_5(%arg0: i32, %arg1: i32) -> (i32, i32) {
    %c0_i32 = arith.constant 0 : i32
    %c0_i32_0 = arith.constant 0 : i32
    %c0_i32_1 = arith.constant 0 : i32
    return %c0_i32, %c0_i32_0 : i32, i32
  }
  func.func @transform_6(%arg0: i32, %arg1: i32) -> (i32, i32) {
    %c0_i32 = arith.constant 0 : i32
    %c0_i32_0 = arith.constant 0 : i32
    %c0_i32_1 = arith.constant 0 : i32
    return %c0_i32, %c0_i32_0 : i32, i32
  }
  func.func @transform_7(%arg0: i32, %arg1: i32) -> (i32, i32) {
    %c0_i32 = arith.constant 0 : i32
    %c0_i32_0 = arith.constant 0 : i32
    %c0_i32_1 = arith.constant 0 : i32
    return %c0_i32, %c0_i32_0 : i32, i32
  }
  func.func @transform_8(%arg0: i32, %arg1: i32) -> (i32, i32) {
    %c0_i32 = arith.constant 0 : i32
    %c0_i32_0 = arith.constant 0 : i32
    %c0_i32_1 = arith.constant 0 : i32
    return %c0_i32, %c0_i32_0 : i32, i32
  }
  func.func @transform_9(%arg0: i32, %arg1: i32) -> (i32, i32) {
    %c0_i32 = arith.constant 0 : i32
    %c0_i32_0 = arith.constant 0 : i32
    %c0_i32_1 = arith.constant 0 : i32
    return %c0_i32, %c0_i32_0 : i32, i32
  }
  func.func @transform_10(%arg0: i32, %arg1: i32) -> (i32, i32) {
    %c0_i32 = arith.constant 0 : i32
    %c0_i32_0 = arith.constant 0 : i32
    %c0_i32_1 = arith.constant 0 : i32
    return %c0_i32, %c0_i32_0 : i32, i32
  }
  func.func @transform_11(%arg0: i32, %arg1: i32) -> (i32, i32) {
    %c0_i32 = arith.constant 0 : i32
    %c0_i32_0 = arith.constant 0 : i32
    %c0_i32_1 = arith.constant 0 : i32
    return %c0_i32, %c0_i32_0 : i32, i32
  }
  func.func @transform_12(%arg0: i32, %arg1: i32) -> (i32, i32, i32) {
    %c0_i32 = arith.constant 0 : i32
    %c0_i32_0 = arith.constant 0 : i32
    return %arg0, %arg1, %c0_i32 : i32, i32, i32
  }
}

</mosaic_0001>

<bundles_post_ra>
// kernel: tpu_custom_call.1
= control target key start
LH: loop header
LB: loop body
LE: loop exit
PB: predicated region body
PF: predicated region fallthrough
CT: control target
= control target key end

     0   :  { %s3456_s0 = inlined_call_operand.hbm [shape: f32[2,8,32], index: 0, kind: input, shape index: {}]   ;;  %s3457_s1 = inlined_call_operand.hbm [shape: f32[2,8,32], index: 1, kind: input, shape index: {}]   ;;  %s3458_s2 = inlined_call_operand.hbm [shape: f32[2,8,32], index: 2, kind: input, shape index: {}]   ;;  %s3459_s3 = inlined_call_operand.vmem [shape: f32[2,1,8], index: 3, kind: input, shape index: {}]   ;;  %s3460_s4 = inlined_call_operand.hbm [shape: f32[32,512], index: 4, kind: input, shape index: {}]   ;;  %s3461_s5 = inlined_call_operand.vmem [shape: f32[1,512], index: 5, kind: input, shape index: {}]   ;;  %s3462_s6 = inlined_call_operand.hbm [shape: f32[32,512], index: 6, kind: input, shape index: {}]   ;;  %s3463_s7 = inlined_call_operand.vmem [shape: f32[1,512], index: 7, kind: input, shape index: {}]   ;;  %s3464_s8 = inlined_call_operand.hbm [shape: f32[32,512], index: 8, kind: input, shape index: {}]   ;;  %s3465_s9 = inlined_call_operand.vmem [shape: f32[1,512], index: 9, kind: input, shape index: {}]   ;;  %s3466_s10 = inlined_call_operand.hbm [shape: f32[512,128], index: 10, kind: input, shape index: {}]   ;;  %s3467_s11 = inlined_call_operand.vmem [shape: f32[1,128], index: 11, kind: input, shape index: {}]   ;;  %s3468_s12 = inlined_call_operand.hbm [shape: f32[2,8,128], index: 12, kind: output, shape index: {}]  }
   0x1   :  { %3494 = sst [smem:[#allocation31_spill]] %s3457_s1 }
   0x2   :  { %3495 = sst [smem:[#allocation32_spill]] %s3459_s3 }
   0x3   :  { %3496 = sst [smem:[#allocation33_spill]] %s3460_s4 }
   0x4   :  { %3497 = sst [smem:[#allocation34_spill]] %s3461_s5 }
   0x5   :  { %3498 = sst [smem:[#allocation35_spill]] %s3464_s8 }
   0x6   :  { %3499 = sst [smem:[#allocation36_spill]] %s3467_s11 }
   0x7   :  { %3500 = sst [smem:[#allocation37_spill]] %s3468_s12 }
   0x8   :  { %17 = vsyncpa [#allocation6], 0 }
   0x9   :  { %19 = vsyncpa [#allocation6 + $0x1], 0 }
   0xa   :  { %20 = vsyncpa [#allocation9], 0 }
   0xb   :  { %22 = vsyncpa [#allocation9 + $0x1], 0 }
   0xc   :  { %23 = vsyncpa [#allocation12], 0 }
   0xd   :  { %24 = vsyncpa [#allocation15], 0 }
   0xe   :  { %25 = vsyncpa [#allocation7], 0 }
   0xf   :  { %27 = vsyncpa [#allocation7 + $0x1], 0  ;;  %s2981_s21 = smov 0   ;;  %s2983_s22 = smov 0  }
  0x10   :  { %s2985_s23 = smov 0   ;;  %s2987_s24 = smov 0  }
  0x11   :  { %s2989_s25 = smov 0   ;;  %s2991_s26 = smov 0  }
  0x12 LB: > { %3501 = sst [smem:[#allocation23_spill]] %s2880_s21  ;;  %s3012_s27 = sadd.s32 4294967295, %s2900_s26   ;;  %s2900_s26 = sphi %s2991_s26, %s33_s26   ;;  %s2896_s25 = sphi %s2989_s25, %s3549_s25   ;;  %s2892_s24 = sphi %s2987_s24, %s3548_s24   ;;  %s2888_s23 = sphi %s2985_s23, %s3552_s23   ;;  %s2884_s22 = sphi %s2983_s22, %s3551_s22   ;;  %s2880_s21 = sphi %s2981_s21, %s3550_s21  }
  0x13   : > { %3502 = sst [smem:[#allocation24_spill]] %s2892_s24  ;;  %p2194_p0 = scmp.ge.s32.totalorder %s2900_s26, 1 }
  0x14   : > { %3503 = sst [smem:[#allocation25_spill]] %s2896_s25  ;;  %p3478_p1 = scmp.eq.s32.totalorder %s3012_s27, 0 }
  0x15   : > { %3504 = sst [smem:[#allocation26_spill]] %s2900_s26  ;;  %p352_p2 = scmp.lt.s32.totalorder %s2900_s26, 3 }
  0x16   : > { %s2902_s29 = smov [#allocation11]   ;;  %s2903_s14 = smov [#allocation14]  }
  0x17   : > { %p3017_p3 = pnand %p2194_p0, %p352_p2  ;;  %s364_s30 = sshll.u32 %s2902_s29, 4  ;;  %s3021_s30 = int_to_ptr.vmem [resolvable:$true] %s364_s30 }
  0x18   : > { %s396_s15 = sshll.u32 %s2903_s14, 4  ;;  %s3507_s4 = sld [smem:[#allocation33_spill]]  ;;  %s3032_s15 = int_to_ptr.vmem [resolvable:$true] %s396_s15 }
  0x19   : > { %s3505_s28 = scalar_select %p3017_p3, 1, 0 }
  0x1a   : > { %p2493_p4 = pneg %p3017_p3 }
  0x1c   : > { %p3028_p6 = pnand %p2493_p4, %p3478_p1 }
  0x1e   : > { %s3506_s13 = scalar_select %p3028_p6, 1, 0 }
  0x1f   : > { %s2604_s18 = scalar_lea.hbm %s3507_s4, 2048  ;;  %p3042_p8 = pneg %p3028_p6 }
  0x20   : > { %p2605_p7 = scmp.ne.s32.totalorder %s3507_s4, %s2604_s18  ;;  %p2611_p11 = scmp.lt.u32.totalorder %s2604_s18, %s3507_s4 }
  0x21   : > { %s3508_s29 = scalar_select %p3042_p8, 1, 0 }
  0x22   : > { %p2607_p9 = pnand %p3042_p8, %p2605_p7 }
  0x24   : > { %p2608_p10 = pneg %p2607_p9 }
  0x26   : > { %p2613_p12 = pnand %p2611_p11, %p2608_p10 }
  0x28   : > { %2616 = shalt.err (!%p2613_p12)
}
  0x29   : > { %s2617_s16 = scalar_lea.vmem %s3021_s30, 2048  ;;  %p2625_p4 = scmp.lt.s32.totalorder %s3021_s30, %s3021_s30 }
  0x2a   : > { %p2618_p13 = scmp.ne.s32.totalorder %s3021_s30, %s2617_s16  ;;  %p2626_p5 = scmp.lt.s32.totalorder %s2617_s16, %s2617_s16 }
  0x2c   : > { %p2620_p0 = pnand %p2618_p13, %p3042_p8  ;;  %p2627_p7 = por %p2626_p5, %p2625_p4 }
  0x2e   : > { %p2621_p2 = pneg %p2620_p0 }
  0x30   : > { %p2628_p9 = pnand %p2627_p7, %p2621_p2 }
  0x32   : > { %2631 = shalt.err (!%p2628_p9)
}
  0x33   : > { %s3471_s17 = smov 512   ;;  %s3472_s12 = smov 32  }
  0x34   : > { %2496 = dma.hbm_to_vmem [thread:$0]  (!%p3028_p6), %s3507_s4, 2048, %s3021_s30, [#allocation12], %s3471_s17, %s3471_s17, %s3472_s12  }
  0x35   : > { %s3509_s8 = sld [smem:[#allocation35_spill]] }
  0x3b   : > { %s2632_s16 = scalar_lea.hbm %s3509_s8, 2048 }
  0x3c   : > { %p2633_p5 = scmp.ne.s32.totalorder %s3509_s8, %s2632_s16  ;;  %p2639_p12 = scmp.lt.u32.totalorder %s2632_s16, %s3509_s8 }
  0x3e   : > { %p2635_p10 = pnand %p2633_p5, %p3042_p8 }
  0x40   : > { %p2636_p11 = pneg %p2635_p10 }
  0x42   : > { %p2641_p13 = pnand %p2639_p12, %p2636_p11 }
  0x44   : > { %2644 = shalt.err (!%p2641_p13)
}
  0x45   : > { %s2645_s30 = scalar_lea.vmem %s3032_s15, 2048  ;;  %p2653_p7 = scmp.lt.s32.totalorder %s3032_s15, %s3032_s15 }
  0x46   : > { %p2646_p0 = scmp.ne.s32.totalorder %s3032_s15, %s2645_s30  ;;  %p2654_p9 = scmp.lt.s32.totalorder %s2645_s30, %s2645_s30 }
  0x48   : > { %p2648_p2 = pnand %p2646_p0, %p3042_p8  ;;  %p2655_p5 = por %p2654_p9, %p2653_p7 }
  0x4a   : > { %p2649_p4 = pneg %p2648_p2 }
  0x4c   : > { %p2656_p10 = pnand %p2655_p5, %p2649_p4 }
  0x4e   : > { %2659 = shalt.err (!%p2656_p10)
}
  0x4f   : > { %2502 = dma.hbm_to_vmem [thread:$0]  (!%p3028_p6), %s3509_s8, 2048, %s3032_s15, [#allocation15], %s3471_s17, %s3471_s17, %s3472_s12  }
  0x50   : > { %s2193_s11 = sadd.s32 4294967294, %s2900_s26   ;;  %s45_s24 = sadd.s32 1, %s2896_s25 }
  0x51   : > { %p47_p11 = scmp.ge.s32.totalorder %s45_s24, 2  ;;  %s54_s18 = sadd.s32 1, %s2888_s23 }
  0x52   : > { %p61_p12 = scmp.ne.s32.totalorder %s2888_s23, %s2884_s22  ;;  %p62_p13 = scmp.eq.s32.totalorder %s2900_s26, 0 }
  0x53   : > { %s3554_s24 = smov (%p47_p11, %s45_s24), 0  ;;  %p67_p2 = scmp.ne.s32.totalorder %s2884_s22, %s2880_s21 }
  0x54   : > { %3510 = sst [smem:[#allocation27_spill]] %s3554_s24  ;;  %p3100_p0 = por %p62_p13, %p61_p12 }
  0x55   : > { %s49_s15 = ssub.s32 %s2896_s25, %s3554_s24  ;;  %p339_p4 = scmp.eq.s32.totalorder %s3012_s27, 1 }
  0x56   : > { %p52_p7 = scmp.eq.s32.totalorder %s49_s15, 0  ;;  %p3111_p9 = por %p3478_p1, %p67_p2 }
  0x57   : > { %p3115_p5 = por %p339_p4, %p61_p12  ;;  %p345_p10 = scmp.eq.s32.totalorder %s2193_s11, 1 }
  0x58   : > { %s3512_s20 = scalar_select %p3111_p9, 1, 0 }
  0x59   : > { %s3513_s14 = scalar_select %p3115_p5, 1, 0 }
  0x5a   : > { %s3120_s16 = scalar_select %p52_p7, %s2888_s23, %s54_s18  }
  0x5b   : > { %3514 = sst [smem:[#allocation28_spill]] %s3513_s14  ;;  %p3122_p11 = por %p345_p10, %p67_p2 }
  0x5c   : > { %3515 = sst [smem:[#allocation29_spill]] %s3120_s16  ;;  %p2524_p13 = scmp.lt.s32.totalorder %s2900_s26, 2 }
  0x5d   : > { %s3516_s30 = scalar_select %p3122_p11, 1, 0 }
  0x5e   : > { %s3473_s3 = sand.u32 1, %s2888_s23   ;;  %s3129_s5 = sshll.u32 %s2896_s25, 7 }
  0x5f   : > { %3517 = sst [smem:[#allocation30_spill]] %s3516_s30  ;;  %s3133_s15 = sshll.u32 %s3473_s3, 3 }
  0x60   : > { %p3137_p12 = pnand %p2524_p13, %p3100_p0  ;;  %s448_s11 = sand.u32 1, %s2900_s26  }
  0x61   : > { %s3519_s1 = sld [smem:[#allocation31_spill]]  ;;  %s452_s8 = scalar_lea.vmem [#allocation8], %s3133_s15 }
  0x62   : > { %s3518_s17 = scalar_select %p3137_p12, 1, 0 }
  0x63   : > { %s459_s3 = sshll.u32 %s452_s8, 4  ;;  %s3151_s19 = scalar_lea.sflag [#allocation9], %s448_s11  ;;  %s3149_s3 = int_to_ptr.vmem [resolvable:$true] %s459_s3 }
  0x64   : > { %p3157_p2 = pneg %p3137_p12 }
  0x66   : > { %s3520_s25 = scalar_select %p3157_p2, 1, 0 }
  0x67   : > { %s3146_s4 = scalar_lea.hbm %s3519_s1, %s3129_s5  ;;  %s2665_s16 = scalar_lea.hbm %s3519_s1, 256 }
  0x68   : > { %s2660_s24 = scalar_lea.hbm %s3146_s4, 128  ;;  %p2666_p10 = scmp.lt.u32.totalorder %s3146_s4, %s3519_s1 }
  0x69   : > { %p2661_p0 = scmp.ne.s32.totalorder %s3146_s4, %s2660_s24  ;;  %p2667_p13 = scmp.lt.u32.totalorder %s2665_s16, %s2660_s24 }
  0x6a   : > { %p2669_p11 = scmp.lt.u32.totalorder %s2660_s24, %s3146_s4 }
  0x6b   : > { %p2663_p4 = pnand %p3157_p2, %p2661_p0  ;;  %p2668_p1 = por %p2667_p13, %p2666_p10 }
  0x6d   : > { %p2664_p7 = pneg %p2663_p4  ;;  %p2670_p5 = por %p2669_p11, %p2668_p1 }
  0x6f   : > { %p2671_p9 = pnand %p2670_p5, %p2664_p7 }
  0x71   : > { %2674 = shalt.err (!%p2671_p9)
}
  0x72   : > { %s2675_s11 = scalar_lea.vmem %s3149_s3, 128  ;;  %s2906_s12 = smov [#allocation8]  }
  0x73   : > { %p2676_p0 = scmp.ne.s32.totalorder %s3149_s3, %s2675_s11  ;;  %s2680_s18 = sshll.u32 %s2906_s12, 4  ;;  %s2681_s18 = int_to_ptr.vmem [resolvable:$false] %s2680_s18 }
  0x74   : > { %s2682_s26 = scalar_lea.vmem %s2681_s18, 256  ;;  %p2683_p6 = scmp.lt.s32.totalorder %s3149_s3, %s2681_s18 }
  0x75   : > { %p2678_p4 = pnand %p2676_p0, %p3157_p2  ;;  %p2684_p8 = scmp.lt.s32.totalorder %s2682_s26, %s2675_s11 }
  0x77   : > { %p2679_p3 = pneg %p2678_p4  ;;  %p2685_p10 = por %p2684_p8, %p2683_p6 }
  0x79   : > { %p2686_p13 = pnand %p2685_p10, %p2679_p3 }
  0x7b   : > { %2689 = shalt.err (!%p2686_p13)
}
  0x7c   : > { %2512 = dma.hbm_to_vmem [thread:$0]  (!%p3137_p12), %s3146_s4, 128, %s3149_s3, %s3151_s19  }
  0x7d   : > { %s2907_s24 = smov [#allocation13]   ;;  %s2908_s8 = smov [#allocation16]  }
  0x7e   : > { %s380_s16 = sshll.u32 %s2907_s24, 4  ;;  %s412_s1 = sshll.u32 %s2908_s8, 4  ;;  %s381_s16 = int_to_ptr.vmem [resolvable:$true] %s380_s16  ;;  %s413_s1 = int_to_ptr.vmem [resolvable:$true] %s412_s1 }
  0x7f   : > { %s2690_s18 = scalar_lea.hbm %s3462_s6, 2048  ;;  %p3521_p3 = scmp.ne.s32.totalorder %s3508_s29, 0 }
  0x80   : > { %p2691_p1 = scmp.ne.s32.totalorder %s3462_s6, %s2690_s18  ;;  %p2697_p9 = scmp.lt.u32.totalorder %s2690_s18, %s3462_s6 }
  0x82   : > { %p2693_p6 = pnand %p2691_p1, %p3521_p3 }
  0x84   : > { %p2694_p8 = pneg %p2693_p6 }
  0x86   : > { %p2699_p5 = pnand %p2697_p9, %p2694_p8 }
  0x88   : > { %2702 = shalt.err (!%p2699_p5)
}
  0x89   : > { %s2703_s4 = scalar_lea.vmem %s381_s16, 2048  ;;  %p2711_p4 = scmp.lt.s32.totalorder %s381_s16, %s381_s16 }
  0x8a   : > { %p2704_p11 = scmp.ne.s32.totalorder %s381_s16, %s2703_s4  ;;  %p2712_p10 = scmp.lt.s32.totalorder %s2703_s4, %s2703_s4 }
  0x8c   : > { %p2706_p7 = pnand %p2704_p11, %p3521_p3  ;;  %p2713_p13 = por %p2712_p10, %p2711_p4 }
  0x8e   : > { %p2707_p0 = pneg %p2706_p7 }
  0x90   : > { %p2714_p12 = pnand %p2713_p13, %p2707_p0 }
  0x92   : > { %2717 = shalt.err (!%p2714_p12)
}
  0x93   : > { %p3522_p1 = scmp.ne.s32.totalorder %s3506_s13, 0  ;;  %s3523_s30 = smov 32  }
  0x94   : > { %s3524_s3 = smov 512   ;;  %s2718_s12 = scalar_lea.hbm %s3466_s10, 8192 }
  0x95   : > { %2499 = dma.hbm_to_vmem [thread:$0]  (!%p3522_p1), %s3462_s6, 2048, %s381_s16, [#allocation12], %s3524_s3, %s3524_s3, %s3523_s30  }
  0x96   : > { %p2719_p6 = scmp.ne.s32.totalorder %s3466_s10, %s2718_s12  ;;  %p2725_p9 = scmp.lt.u32.totalorder %s2718_s12, %s3466_s10 }
  0x98   : > { %p2721_p12 = pnand %p2719_p6, %p3521_p3 }
  0x9a   : > { %p2722_p8 = pneg %p2721_p12 }
  0x9c   : > { %p2727_p5 = pnand %p2725_p9, %p2722_p8 }
  0x9e   : > { %2730 = shalt.err (!%p2727_p5)
}
  0x9f   : > { %s2731_s21 = scalar_lea.vmem %s413_s1, 8192  ;;  %p2739_p4 = scmp.lt.s32.totalorder %s413_s1, %s413_s1 }
  0xa0   : > { %p2732_p11 = scmp.ne.s32.totalorder %s413_s1, %s2731_s21  ;;  %p2740_p10 = scmp.lt.s32.totalorder %s2731_s21, %s2731_s21 }
  0xa2   : > { %p2734_p7 = pnand %p2732_p11, %p3521_p3  ;;  %p2741_p13 = por %p2740_p10, %p2739_p4 }
  0xa4   : > { %p2735_p0 = pneg %p2734_p7 }
  0xa6   : > { %p2742_p2 = pnand %p2741_p13, %p2735_p0 }
  0xa8   : > { %2745 = shalt.err (!%p2742_p2)
}
  0xa9   : > { %s2909_s16 = smov 128   ;;  %s2910_s30 = smov 8  }
  0xaa   : > { %2505 = dma.hbm_to_vmem [thread:$0]  (!%p3522_p1), %s3466_s10, 8192, %s413_s1, [#allocation15], %s2909_s16, %s2909_s16, %s2910_s30  }
  0xab   : > { %s3224_s8 = scalar_lea.hbm %s3456_s0, %s3129_s5  ;;  %s433_s12 = scalar_lea.vmem [#allocation5], %s3133_s15 }
  0xac   : > { %s441_s18 = sshll.u32 %s433_s12, 4  ;;  %s3233_s13 = scalar_lea.hbm %s3458_s2, %s3129_s5  ;;  %s3227_s18 = int_to_ptr.vmem [resolvable:$true] %s441_s18 }
  0xad   : > { %s3525_s4 = sand.u32 1, %s2888_s23   ;;  %s2746_s21 = scalar_lea.hbm %s3224_s8, 128 }
  0xae   : > { %s430_s1 = scalar_lea.sflag [#allocation6], %s3525_s4  ;;  %p2747_p2 = scmp.ne.s32.totalorder %s3224_s8, %s2746_s21 }
  0xaf   : > { %p3526_p3 = scmp.ne.s32.totalorder %s3520_s25, 0  ;;  %s2751_s3 = scalar_lea.hbm %s3456_s0, 256 }
  0xb0   : > { %p2752_p12 = scmp.lt.u32.totalorder %s3224_s8, %s3456_s0  ;;  %p2753_p8 = scmp.lt.u32.totalorder %s2751_s3, %s2746_s21 }
  0xb1   : > { %p2749_p1 = pnand %p2747_p2, %p3526_p3  ;;  %p2755_p5 = scmp.lt.u32.totalorder %s2746_s21, %s3224_s8 }
  0xb2   : > { %p2754_p9 = por %p2753_p8, %p2752_p12 }
  0xb3   : > { %p2750_p6 = pneg %p2749_p1 }
  0xb4   : > { %p2756_p11 = por %p2755_p5, %p2754_p9 }
  0xb6   : > { %p2757_p7 = pnand %p2756_p11, %p2750_p6 }
  0xb8   : > { %2760 = shalt.err (!%p2757_p7)
}
  0xb9   : > { %s2761_s5 = scalar_lea.vmem %s3227_s18, 128  ;;  %s2911_s24 = smov [#allocation5]  }
  0xba   : > { %p2762_p0 = scmp.ne.s32.totalorder %s3227_s18, %s2761_s5  ;;  %s2766_s12 = sshll.u32 %s2911_s24, 4  ;;  %s2767_s12 = int_to_ptr.vmem [resolvable:$false] %s2766_s12 }
  0xbb   : > { %s2768_s11 = scalar_lea.vmem %s2767_s12, 256  ;;  %p2769_p13 = scmp.lt.s32.totalorder %s3227_s18, %s2767_s12 }
  0xbc   : > { %p2764_p4 = pnand %p2762_p0, %p3526_p3  ;;  %p2770_p2 = scmp.lt.s32.totalorder %s2768_s11, %s2761_s5 }
  0xbe   : > { %p2765_p10 = pneg %p2764_p4  ;;  %p2771_p1 = por %p2770_p2, %p2769_p13 }
  0xc0   : > { %p2772_p12 = pnand %p2771_p1, %p2765_p10 }
  0xc2   : > { %2775 = shalt.err (!%p2772_p12)
}
  0xc3   : > { %p3527_p6 = scmp.ne.s32.totalorder %s3518_s17, 0  ;;  %s470_s26 = scalar_lea.vmem [#allocation10], %s3133_s15 }
  0xc4   : > { %s477_s4 = sshll.u32 %s470_s26, 4  ;;  %s2776_s21 = scalar_lea.hbm %s3233_s13, 128  ;;  %s478_s4 = int_to_ptr.vmem [resolvable:$true] %s477_s4 }
  0xc5   : > { %2509 = dma.hbm_to_vmem [thread:$0]  (!%p3527_p6), %s3224_s8, 128, %s3227_s18, %s430_s1  }
  0xc6   : > { %p2777_p8 = scmp.ne.s32.totalorder %s3233_s13, %s2776_s21  ;;  %s2781_s3 = scalar_lea.hbm %s3458_s2, 256 }
  0xc7   : > { %p2782_p11 = scmp.lt.u32.totalorder %s3233_s13, %s3458_s2  ;;  %p2783_p7 = scmp.lt.u32.totalorder %s2781_s3, %s2776_s21 }
  0xc8   : > { %p2779_p9 = pnand %p2777_p8, %p3526_p3  ;;  %p2785_p4 = scmp.lt.u32.totalorder %s2776_s21, %s3233_s13 }
  0xc9   : > { %p2784_p0 = por %p2783_p7, %p2782_p11 }
  0xca   : > { %p2780_p5 = pneg %p2779_p9 }
  0xcb   : > { %p2786_p10 = por %p2785_p4, %p2784_p0 }
  0xcd   : > { %p2787_p13 = pnand %p2786_p10, %p2780_p5 }
  0xcf   : > { %2790 = shalt.err (!%p2787_p13)
}
  0xd0   : > { %s2791_s15 = scalar_lea.vmem %s478_s4, 128  ;;  %s2912_s8 = smov [#allocation10]  }
  0xd1   : > { %p2792_p2 = scmp.ne.s32.totalorder %s478_s4, %s2791_s15  ;;  %s2796_s18 = sshll.u32 %s2912_s8, 4  ;;  %s2797_s18 = int_to_ptr.vmem [resolvable:$false] %s2796_s18 }
  0xd2   : > { %s2798_s1 = scalar_lea.vmem %s2797_s18, 256  ;;  %p2799_p8 = scmp.lt.s32.totalorder %s478_s4, %s2797_s18 }
  0xd3   : > { %p2794_p1 = pnand %p2792_p2, %p3526_p3  ;;  %p2800_p9 = scmp.lt.s32.totalorder %s2798_s1, %s2791_s15 }
  0xd5   : > { %p2795_p12 = pneg %p2794_p1  ;;  %p2801_p6 = por %p2800_p9, %p2799_p8 }
  0xd7   : > { %p2802_p7 = pnand %p2801_p6, %p2795_p12 }
  0xd9   : > { %2805 = shalt.err (!%p2802_p7)
}
  0xda   : > { %p3528_p11 = scmp.ne.s32.totalorder %s3518_s17, 0  ;;  %p3529_p5 = scmp.ne.s32.totalorder %s3505_s28, 0 }
  0xdb   : > { %s3280_s25 = sand.u32 (!%p3529_p5), 1, %s2884_s22   ;;  %p3530_p3 = scmp.ne.s32.totalorder (!%p3529_p5), %s3512_s20, 0 }
  0xdc   : > { %2515 = dma.hbm_to_vmem [thread:$0]  (!%p3528_p11), %s3233_s13, 128, %s478_s4, %s3151_s19  }
  0xdd   : > { %492 = sbr.rel (%p3529_p5) target bundleno = 1465 (0x5b9), region = 68  ;;  %s3283_s5 = sshll.u32 (!%p3529_p5), %s3280_s25, 3 }
  0xde   : > { %s495_s24 = scalar_lea.sflag (!%p3529_p5), [#allocation6], %s3280_s25  ;;  %s498_s12 = scalar_lea.vmem (!%p3529_p5), [#allocation5], %s3283_s5 }
  0xe4   : > { %2859 = dma.done.wait (%p3530_p3), %s495_s24, 128  }
  0xe5   : > { %2861 = vsyncadd (%p3530_p3), %s495_s24, 4294967168  ;;  %s503_s28 = sand.u32 1, %s3012_s27   ;;  %s507_s19 = scalar_lea.vmem [#allocation8], %s3283_s5 }
  0xe6   : > { %s504_s17 = scalar_lea.sflag [#allocation9], %s503_s28 }
  0xe7   : > { %2863 = dma.done.wait (%p3530_p3), %s504_s17, 256  }
  0xe8   : > { %2865 = vsyncadd (%p3530_p3), %s504_s17, 4294967040  ;;  %s516_s13 = scalar_lea.vmem [#allocation10], %s3283_s5  ;;  %p3531_p6 = scmp.eq.s32.totalorder %s3012_s27, 0 }
  0xea   : > { %2867 = dma.done.wait (%p3531_p6), [#allocation12], 4096   ;;  %p3532_p0 = pmov %p3531_p6 }
  0xec   : > { %2869 = vsyncadd (%p3532_p0), [#allocation12], 4294963200  ;;  %p3533_p4 = pmov %p3532_p0 }
  0xed   : > { %p3534_p10 = pmov %p3532_p0 }
  0xee   : > { %2871 = dma.done.wait (%p3533_p4), [#allocation15], 10240  }
  0xef   : > { %2873 = vsyncadd (%p3534_p10), [#allocation15], 4294957056  ;;  %v2913_v0 = vmov 0.0   ;;  %v595_v1 = vld [vmem:[#allocation13 + $0x8] sm:$0xff]  ;;  %v594_v3 = vld [vmem:[#allocation13] sm:$0xff]  ;;  %vm632_vm0 = vcmask 261120  }
  0xf0   : > { %700 = vmatprep.mubr.f32.mxu0 %v2913_v0  ;;  %771 = vmatprep.mubr.f32.mxu1 %v2913_v0  ;;  %v599_v2 = vld [vmem:[#allocation13 + $0x28] sm:$0xff]  ;;  %v598_v5 = vld [vmem:[#allocation13 + $0x20] sm:$0xff]  ;;  %v597_v12 = vld [vmem:[#allocation13 + $0x18] sm:$0xff]  ;;  %vm2914_vm1 = vmmov 0   ;;  %s3535_s16 = sld [smem:[#allocation34_spill]]  ;;  %s3537_s15 = sld [smem:[#allocation32_spill]] }
  0xf1   : > { %v2357_v4 = vpack.c.bf16 %v599_v2, %v595_v1  ;;  %v603_v6 = vld [vmem:[#allocation13 + $0x48] sm:$0xff]  ;;  %v2359_v8 = vpack.c.bf16 %v598_v5, %v594_v3  ;;  %v602_v10 = vld [vmem:[#allocation13 + $0x40] sm:$0xff]  ;;  %v601_v13 = vld [vmem:[#allocation13 + $0x38] sm:$0xff]  ;;  %s3536_s30 = sld [smem:[#allocation24_spill]]  ;;  %vm1234_vm2 = vcmask 64512   ;;  %s3538_s24 = sld [smem:[#allocation36_spill]] }
  0xf2   : > { %v607_v7 = vld [vmem:[#allocation13 + $0x68] sm:$0xff]  ;;  %v606_v11 = vld [vmem:[#allocation13 + $0x60] sm:$0xff]  ;;  %v596_v14 = vld [vmem:[#allocation13 + $0x10] sm:$0xff]  ;;  %v2365_v16 = vpack.c.bf16 %v601_v13, %v597_v12  ;;  %v612_v13 = vlaneseq  ;;  %s585_s17 = scalar_lea.vmem [#allocation17], %s3283_s5  ;;  %s3540_s20 = sld [smem:[#allocation37_spill]] }
  0xf3   : > { %v2361_v9 = vpack.c.bf16 %v607_v7, %v603_v6  ;;  %2358 = vmatprep.subr.bf16.mxu0 %v2357_v4  ;;  %v2363_v15 = vpack.c.bf16 %v606_v11, %v602_v10  ;;  %v600_v17 = vld [vmem:[#allocation13 + $0x30] sm:$0xff]  ;;  %v784_v18 = vld [vmem:[#allocation14 + $0x8] sm:$0xff]  ;;  %v783_v22 = vld [vmem:[#allocation14] sm:$0xff]  ;;  %s2008_s26 = scalar_lea.sflag [#allocation7], %s3280_s25  ;;  %s2915_s5 = smov [#allocation17]  }
  0xf4   : > { %2360 = vmatpush1.bf16.msra.mxu0 %v2359_v8  ;;  %v788_v19 = vld [vmem:[#allocation14 + $0x28] sm:$0xff]  ;;  %v2367_v20 = vpack.c.bf16 %v600_v17, %v596_v14  ;;  %v787_v23 = vld [vmem:[#allocation14 + $0x20] sm:$0xff]  ;;  %v605_v24 = vld [vmem:[#allocation13 + $0x58] sm:$0xff]  ;;  %2366 = vmatprep.subr.bf16.mxu1 %v2365_v16  ;;  %v613_v14 = vshrl.u32 %v612_v13, 7  ;;  %s2810_s21 = sshll.u32 %s2915_s5, 4  ;;  %s2811_s21 = int_to_ptr.vmem [resolvable:$false] %s2810_s21 }
  0xf5   : > { %2362 = vmatprep.subr.bf16.mxu0 %v2361_v9  ;;  %v2373_v21 = vpack.c.bf16 %v788_v19, %v784_v18  ;;  %v609_v25 = vld [vmem:[#allocation13 + $0x78] sm:$0xff]  ;;  %v604_v26 = vld [vmem:[#allocation13 + $0x50] sm:$0xff]  ;;  %v593_v28 = vld [vmem:[%s507_s19] sm:$0xff]  ;;  %v2375_v33 = vpack.c.bf16 %v787_v23, %v783_v22  ;;  %s2022_s19 = sshll.u32 %s585_s17, 4  ;;  %s3409_s19 = int_to_ptr.vmem [resolvable:$true] %s2022_s19 }
  0xf6   : > { %v608_v27 = vld [vmem:[#allocation13 + $0x70] sm:$0xff]  ;;  %2368 = vmatpush1.bf16.msra.mxu1 %v2367_v20  ;;  %v2369_v29 = vpack.c.bf16 %v609_v25, %v605_v24  ;;  %v792_v31 = vld [vmem:[#allocation14 + $0x48] sm:$0xff]  ;;  %v791_v34 = vld [vmem:[#allocation14 + $0x40] sm:$0xff]  ;;  %v618_v16 = vsub.s32 1, %v613_v14  ;;  %v622_v18 = vsub.s32 2, %v613_v14  ;;  %v626_v20 = vsub.s32 3, %v613_v14  ;;  %p2813_p9 = scmp.lt.s32.totalorder %s3409_s19, %s2811_s21 }
  0xf7   : > { %v2371_v30 = vpack.c.bf16 %v608_v27, %v604_v26  ;;  %v796_v32 = vld [vmem:[#allocation14 + $0x68] sm:$0xff]  ;;  %v786_v35 = vld [vmem:[#allocation14 + $0x18] sm:$0xff]  ;;  %v795_v38 = vld [vmem:[#allocation14 + $0x60] sm:$0xff]  ;;  %v614_v22 = vsub.s32 0, %v613_v14  ;;  %p586_p13 = scmp.lt.s32.totalorder %s3536_s30, 1  ;;  %s2228_s28 = sshll.u32 %s3536_s30, 7 }
  0xf8   : > { %2364 = vmatpush1.bf16.msra.mxu0 %v2363_v15  ;;  %v790_v36 = vld [vmem:[#allocation14 + $0x38] sm:$0xff]  ;;  %2370 = vmatprep.subr.bf16.mxu1 %v2369_v29  ;;  %v2377_v37 = vpack.c.bf16 %v796_v32, %v792_v31  ;;  %v785_v40 = vld [vmem:[#allocation14 + $0x10] sm:$0xff]  ;;  %v972_v42 = vld [vmem:[#allocation11 + $0x8] sm:$0xff]  ;;  %v2379_v47 = vpack.c.bf16 %v795_v38, %v791_v34  ;;  %s3407_s11 = scalar_lea.hbm %s3540_s20, %s2228_s28  ;;  %s2806_s4 = scalar_lea.vmem %s3409_s19, 128 }
  0xf9   : > { %2374 = vmatprep.subr.bf16.mxu0 %v2373_v21  ;;  %v2381_v39 = vpack.c.bf16 %v790_v36, %v786_v35  ;;  %v789_v41 = vld [vmem:[#allocation14 + $0x30] sm:$0xff]  ;;  %v976_v43 = vld [vmem:[#allocation11 + $0x28] sm:$0xff]  ;;  %v794_v45 = vld [vmem:[#allocation14 + $0x58] sm:$0xff]  ;;  %s587_s3 = scalar_select %p586_p13, %s3536_s30, 1 }
  0xfa   : > { %2372 = vmatpush1.bf16.msra.mxu1 %v2371_v30  ;;  %v2383_v44 = vpack.c.bf16 %v789_v41, %v785_v40  ;;  %v798_v46 = vld [vmem:[#allocation14 + $0x78] sm:$0xff]  ;;  %v793_v49 = vld [vmem:[#allocation14 + $0x50] sm:$0xff]  ;;  %v2389_v51 = vpack.c.bf16 %v976_v43, %v972_v42  ;;  %v971_v52 = vld [vmem:[#allocation11] sm:$0xff]  ;;  %p2807_p2 = scmp.ne.s32.totalorder %s3409_s19, %s2806_s4 }
  0xfb   : > { %2215 = vmatmul.mubr.msk.f32.vlgmr.msra.gmra.mrb[0].mxu0 %vm632_vm0, %v593_v28  ;;  %v2385_v48 = vpack.c.bf16 %v798_v46, %v794_v45  ;;  %v797_v50 = vld [vmem:[#allocation14 + $0x70] sm:$0xff]  ;;  %2382 = vmatprep.subr.bf16.mxu1 %v2381_v39  ;;  %v975_v53 = vld [vmem:[#allocation11 + $0x20] sm:$0xff]  ;;  %v980_v54 = vld [vmem:[#allocation11 + $0x48] sm:$0xff]  ;;  %s588_s8 = scalar_lea.vmem %s3537_s15, %s587_s3 }
  0xfc   : > { %2376 = vmatpush1.bf16.msra.mxu0 %v2375_v33  ;;  %888 = vmatprep.mubr.f32.mxu0 %v2913_v0  ;;  %v984_v55 = vld [vmem:[#allocation11 + $0x68] sm:$0xff]  ;;  %v974_v56 = vld [vmem:[#allocation11 + $0x18] sm:$0xff]  ;;  %v2387_v59 = vpack.c.bf16 %v797_v50, %v793_v49  ;;  %v2391_v60 = vpack.c.bf16 %v975_v53, %v971_v52  ;;  %v979_v61 = vld [vmem:[#allocation11 + $0x40] sm:$0xff] }
  0xfd   : > { %2378 = vmatprep.subr.bf16.mxu0 %v2377_v37  ;;  %2216 = vmatmul.mubr.msk.f32.vlgmr.msra.gmra.mrb[0].mxu1 %vm632_vm0, %v593_v28  ;;  %v978_v57 = vld [vmem:[#allocation11 + $0x38] sm:$0xff]  ;;  %v973_v62 = vld [vmem:[#allocation11 + $0x10] sm:$0xff]  ;;  %v2393_v1 = vpack.c.bf16 %v984_v55, %v980_v54  ;;  %v983_v2 = vld [vmem:[#allocation11 + $0x60] sm:$0xff] }
  0xfe   : > { %v782_v58 = vld [vmem:[%s516_s13] sm:$0xff]  ;;  %2384 = vmatpush1.bf16.msra.mxu1 %v2383_v44  ;;  %959 = vmatprep.mubr.f32.mxu1 %v2913_v0  ;;  %v2397_v3 = vpack.c.bf16 %v978_v57, %v974_v56  ;;  %v2395_v7 = vpack.c.bf16 %v983_v2, %v979_v61 }
  0xff   : > { %2386 = vmatprep.subr.bf16.mxu1 %v2385_v48  ;;  %v977_v63 = vld [vmem:[#allocation11 + $0x30] sm:$0xff]  ;;  %v982_v4 = vld [vmem:[#allocation11 + $0x58] sm:$0xff] }
 0x100   : > { %2380 = vmatpush1.bf16.msra.mxu0 %v2379_v47  ;;  %v986_v5 = vld [vmem:[#allocation11 + $0x78] sm:$0xff]  ;;  %v2399_v6 = vpack.c.bf16 %v977_v63, %v973_v62  ;;  %v981_v9 = vld [vmem:[#allocation11 + $0x50] sm:$0xff] }
 0x101   : > { %2390 = vmatprep.subr.bf16.mxu0 %v2389_v51  ;;  %v2401_v8 = vpack.c.bf16 %v986_v5, %v982_v4  ;;  %v985_v10 = vld [vmem:[#allocation11 + $0x70] sm:$0xff] }
 0x102   : > { %2388 = vmatpush1.bf16.msra.mxu1 %v2387_v59  ;;  %v2403_v11 = vpack.c.bf16 %v985_v10, %v981_v9  ;;  %v970_v12 = vld [vmem:[%s498_s12] sm:$0xff]  ;;  %s3539_s12 = sld [smem:[#allocation28_spill]] }
 0x103   : > { %2217 = vmatmul.mubr.msk.f32.vlgmr.msra.gmra.mrb[2].mxu0 %vm632_vm0, %v782_v58  ;;  %2398 = vmatprep.subr.bf16.mxu1 %v2397_v3  ;;  %v799_v15 = vld [vmem:[%s3465_s9] sm:$0xf] }
 0x104   : > { %2392 = vmatpush1.bf16.msra.mxu0 %v2391_v60  ;;  %1077 = vmatprep.mubr.f32.mxu0 %v2913_v0  ;;  %v808_v17 = vrot.slane %v799_v15, %v618_v16  ;;  %v812_v19 = vrot.slane %v799_v15, %v622_v18  ;;  %v816_v21 = vrot.slane %v799_v15, %v626_v20  ;;  %v610_v23 = vld [vmem:[%s3463_s7] sm:$0xf] }
 0x105   : > { %2394 = vmatprep.subr.bf16.mxu0 %v2393_v1  ;;  %2218 = vmatmul.mubr.msk.f32.vlgmr.msra.gmra.mrb[2].mxu1 %vm632_vm0, %v782_v58  ;;  %v615_v24 = vrot.slane %v610_v23, %v614_v22  ;;  %v804_v30 = vrot.slane %v799_v15, %v614_v22  ;;  %v987_v35 = vld [vmem:[%s3535_s16] sm:$0xf]  ;;  %v619_v41 = vrot.slane %v610_v23, %v618_v16  ;;  %s2812_s16 = scalar_lea.vmem %s2811_s21, 256 }
 0x106   : > { %2400 = vmatpush1.bf16.msra.mxu1 %v2399_v6  ;;  %1148 = vmatprep.mubr.f32.mxu1 %v2913_v0  ;;  %v992_v39 = vrot.slane %v987_v35, %v614_v22  ;;  %v996_v44 = vrot.slane %v987_v35, %v618_v16  ;;  %v623_v47 = vrot.slane %v610_v23, %v622_v18  ;;  %v2221_v58 = vld [vmem:[%s588_s8] ss:$0 sm:$0xff]  ;;  %p2814_p7 = scmp.lt.s32.totalorder %s2812_s16, %s2806_s4 }
 0x107   : > { %2402 = vmatprep.subr.bf16.mxu1 %v2401_v8  ;;  %v1000_v48 = vrot.slane %v987_v35, %v622_v18  ;;  %v627_v53 = vrot.slane %v610_v23, %v626_v20  ;;  %v1004_v55 = vrot.slane %v987_v35, %v626_v20  ;;  %v1795_v35 = vld [vmem:[#allocation16] sm:$0xff] }
 0x108   : > { %2396 = vmatpush1.bf16.msra.mxu0 %v2395_v7  ;;  %p3541_p1 = scmp.ne.s32.totalorder %s3539_s12, 0  ;;  %p2815_p11 = por %p2814_p7, %p2813_p9 }
 0x109   : > { %2317 = vmatprep.subr.mxu0 %v2913_v0 }
 0x10a   : > { %2404 = vmatpush1.bf16.msra.mxu1 %v2403_v11  ;;  %p2808_p12 = pnand %p2807_p2, %p3541_p1 }
 0x10b   : > { %2219 = vmatmul.mubr.msk.f32.vlgmr.msra.gmra.mrb[4].mxu0 %vm632_vm0, %v970_v12  ;;  %2322 = vmatprep.subr.mxu1 %v2913_v0 }
 0x10c   : > { %2319 = vmatprep.mubr.msk.f32.mxu0 %vm2914_vm1, %v2913_v0  ;;  %p2809_p8 = pneg %p2808_p12 }
 0x10d   : > { %2220 = vmatmul.mubr.msk.f32.vlgmr.msra.gmra.mrb[4].mxu1 %vm632_vm0, %v970_v12 }
 0x10e   : > { %2324 = vmatprep.mubr.msk.f32.mxu1 %vm2914_vm1, %v2913_v0  ;;  %p2816_p5 = pnand %p2815_p11, %p2809_p8 }
 0x1ce   : > { %v702_v25 = vpop.f32.mrb[0].mxu0 }
 0x1cf   : > { %v703_v26 = vadd.f32 %v702_v25, %v615_v24  ;;  %v704_v27 = vpop.f32.mrb[1].mxu0 }
 0x1d0   : > { %v773_v28 = vpop.f32.mrb[0].mxu1  ;;  %v705_v46 = vadd.f32 %v704_v27, %v619_v41  ;;  %v1814_v41 = vld [vmem:[#allocation16 + $0x98] sm:$0xff] }
 0x1d1   : > { %2318 = vmatpush3.xpose.msra.mxu0 %v703_v26  ;;  %v775_v29 = vpop.f32.mrb[1].mxu1  ;;  %v774_v52 = vadd.f32 %v773_v28, %v623_v47  ;;  %v1816_v47 = vld [vmem:[#allocation16 + $0xa8] sm:$0xff] }
 0x1d2   : > { %2327 = vmatprep.subr.mxu0 %v2913_v0  ;;  %v776_v56 = vadd.f32 %v775_v29, %v627_v53  ;;  %v1818_v53 = vld [vmem:[#allocation16 + $0xb8] sm:$0xff] }
 0x1d6   : > { %v890_v31 = vpop.f32.mrb[2].mxu0 }
 0x1d7   : > { %v891_v32 = vadd.f32 %v890_v31, %v804_v30  ;;  %v892_v33 = vpop.f32.mrb[3].mxu0 }
 0x1d8   : > { %v3337_v34 = vadd.f32 %v892_v33, %v808_v17  ;;  %v961_v36 = vpop.f32.mrb[2].mxu1  ;;  %v1812_v33 = vld [vmem:[#allocation16 + $0x88] sm:$0xff] }
 0x1d9   : > { %2323 = vmatpush3.msra.mxu1 %v891_v32  ;;  %v3342_v37 = vadd.f32 %v961_v36, %v812_v19  ;;  %v963_v38 = vpop.f32.mrb[3].mxu1  ;;  %v1811_v32 = vld [vmem:[#allocation16 + $0x80] sm:$0xff] }
 0x1da   : > { %2332 = vmatprep.subr.mxu1 %v2913_v0  ;;  %v3345_v40 = vadd.f32 %v963_v38, %v816_v21  ;;  %v2405_v36 = vpack.c.bf16 %v1812_v33, %v1811_v32  ;;  %v1796_v38 = vld [vmem:[#allocation16 + $0x8] sm:$0xff] }
 0x1de   : > { %v1079_v42 = vpop.f32.mrb[4].mxu0 }
 0x1df   : > { %v1080_v43 = vadd.f32 %v1079_v42, %v992_v39  ;;  %v1081_v45 = vpop.f32.mrb[5].mxu0  ;;  %v1813_v39 = vld [vmem:[#allocation16 + $0x90] sm:$0xff]  ;;  %v2407_v42 = vpack.c.bf16 %v1796_v38, %v1795_v35  ;;  %v1847_v38 = vld [vmem:[#allocation16 + $0x1a0] sm:$0xff] }
 0x1e0   : > { %v1150_v49 = vpop.f32.mrb[4].mxu1  ;;  %v1082_v51 = vadd.f32 %v1081_v45, %v996_v44  ;;  %v1797_v44 = vld [vmem:[#allocation16 + $0x10] sm:$0xff]  ;;  %v1798_v45 = vld [vmem:[#allocation16 + $0x18] sm:$0xff] }
 0x1e1   : > { %2320 = vmatmul.mubr.f32.vlgmr.msra.gmra.mrb[6].mxu0 %v1080_v43  ;;  %v1152_v50 = vpop.f32.mrb[5].mxu1  ;;  %v1151_v54 = vadd.f32 %v1150_v49, %v1000_v48  ;;  %v2409_v43 = vpack.c.bf16 %v1814_v41, %v1813_v39  ;;  %v2411_v48 = vpack.c.bf16 %v1798_v45, %v1797_v44  ;;  %v1829_v35 = vld [vmem:[#allocation16 + $0x110] sm:$0xff]  ;;  %v1848_v39 = vld [vmem:[#allocation16 + $0x1a8] sm:$0xff]  ;;  %v1850_v45 = vld [vmem:[#allocation16 + $0x1b8] sm:$0xff] }
 0x1e2   : > { %2328 = vmatpush3.xpose.msra.mxu0 %v705_v46  ;;  %2329 = vmatprep.mubr.msk.f32.mxu0 %vm2914_vm1, %v2913_v0  ;;  %v1153_v57 = vadd.f32 %v1152_v50, %v1004_v55  ;;  %v1815_v46 = vld [vmem:[#allocation16 + $0xa0] sm:$0xff]  ;;  %v1849_v44 = vld [vmem:[#allocation16 + $0x1b0] sm:$0xff] }
 0x1e3   : > { %2337 = vmatprep.subr.mxu0 %v2913_v0  ;;  %v2413_v49 = vpack.c.bf16 %v1816_v47, %v1815_v46  ;;  %v1799_v50 = vld [vmem:[#allocation16 + $0x20] sm:$0xff]  ;;  %v1833_v46 = vld [vmem:[#allocation16 + $0x130] sm:$0xff]  ;;  %v1834_v47 = vld [vmem:[#allocation16 + $0x138] sm:$0xff] }
 0x1e5   : > { %2330 = vmatmul.mubr.f32.vlgmr.msra.gmra.mrb[8].mxu0 %v1082_v51  ;;  %v1800_v51 = vld [vmem:[#allocation16 + $0x28] sm:$0xff] }
 0x1e6   : > { %2338 = vmatpush3.xpose.msra.mxu0 %v774_v52  ;;  %2339 = vmatprep.mubr.msk.f32.mxu0 %vm2914_vm1, %v2913_v0  ;;  %v1817_v52 = vld [vmem:[#allocation16 + $0xb0] sm:$0xff] }
 0x1e7   : > { %2347 = vmatprep.subr.mxu0 %v2913_v0  ;;  %v2417_v55 = vpack.c.bf16 %v1818_v53, %v1817_v52  ;;  %v1835_v52 = vld [vmem:[#allocation16 + $0x140] sm:$0xff]  ;;  %v1836_v53 = vld [vmem:[#allocation16 + $0x148] sm:$0xff] }
 0x1e9   : > { %2340 = vmatmul.mubr.f32.vlgmr.msra.gmra.mrb[10].mxu0 %v1151_v54  ;;  %v2415_v54 = vpack.c.bf16 %v1800_v51, %v1799_v50  ;;  %v2451_v50 = vpack.c.bf16 %v1834_v47, %v1833_v46 }
 0x1ea   : > { %2348 = vmatpush3.xpose.msra.mxu0 %v776_v56  ;;  %2349 = vmatprep.mubr.msk.f32.mxu0 %vm2914_vm1, %v2913_v0  ;;  %v1801_v56 = vld [vmem:[#allocation16 + $0x30] sm:$0xff] }
 0x1eb   : > { %2406 = vmatprep.subr.bf16.mxu0 %v2405_v36  ;;  %v1830_v36 = vld [vmem:[#allocation16 + $0x118] sm:$0xff] }
 0x1ec   : > { %v2443_v41 = vpack.c.bf16 %v1830_v36, %v1829_v35 }
 0x1ed   : > { %2350 = vmatmul.mubr.f32.vlgmr.msra.gmra.mrb[12].mxu0 %v1153_v57  ;;  %v1802_v57 = vld [vmem:[#allocation16 + $0x38] sm:$0xff] }
 0x1ee   : > { %2408 = vmatpush3.bf16.msra.mxu0 %v2407_v42  ;;  %v2445_v42 = vpack.c.bf16 %v1848_v39, %v1847_v38 }
 0x1ef   : > { %2410 = vmatprep.subr.bf16.mxu0 %v2409_v43  ;;  %v1831_v43 = vld [vmem:[#allocation16 + $0x120] sm:$0xff] }
 0x1f2   : > { %2412 = vmatpush3.bf16.msra.mxu0 %v2411_v48  ;;  %v1851_v48 = vld [vmem:[#allocation16 + $0x1c0] sm:$0xff] }
 0x1f3   : > { %2414 = vmatprep.subr.bf16.mxu0 %v2413_v49  ;;  %v1852_v49 = vld [vmem:[#allocation16 + $0x1c8] sm:$0xff] }
 0x1f4   : > { %v2453_v51 = vpack.c.bf16 %v1852_v49, %v1851_v48 }
 0x1f6   : > { %2416 = vmatpush3.bf16.msra.mxu0 %v2415_v54  ;;  %v2455_v54 = vpack.c.bf16 %v1836_v53, %v1835_v52 }
 0x1f7   : > { %2418 = vmatprep.subr.bf16.mxu0 %v2417_v55  ;;  %v1825_v55 = vld [vmem:[#allocation16 + $0xf0] sm:$0xff] }
 0x2b4   : > { %v1230_v59 = vpop.f32.mrb[6].mxu0 }
 0x2b5   : > { %v1231_v60 = vadd.f32 %v2221_v58, %v1230_v59  ;;  %v2321_v61 = vpop.f32.mrb[7].mxu0  ;;  %v1820_v59 = vld [vmem:[#allocation16 + $0xc8] sm:$0xff] }
 0x2b7   : > { %v1235_v62 = vsel %vm1234_vm2, %v1231_v60, -inf }
 0x2b8   : > { %1236 = vmax.xlane.f32.xlu0 %v1235_v62  ;;  %v1388_v63 = vpop.f32.mrb[8].mxu0  ;;  %v1803_v62 = vld [vmem:[#allocation16 + $0x40] sm:$0xff] }
 0x2b9   : > { %v1389_v1 = vadd.f32 %v2221_v58, %v1388_v63  ;;  %v2331_v2 = vpop.f32.mrb[9].mxu0  ;;  %v1804_v63 = vld [vmem:[#allocation16 + $0x48] sm:$0xff] }
 0x2ba   : > { %v1822_v2 = vld [vmem:[#allocation16 + $0xd8] sm:$0xff] }
 0x2bb   : > { %v1392_v3 = vsel %vm1234_vm2, %v1389_v1, -inf }
 0x2bc   : > { %1393 = vmax.xlane.f32.xlu0 %v1392_v3  ;;  %v1545_v4 = vpop.f32.mrb[10].mxu0  ;;  %v2423_v3 = vpack.c.bf16 %v1804_v63, %v1803_v62 }
 0x2bd   : > { %v1546_v5 = vadd.f32 %v2221_v58, %v1545_v4  ;;  %v2341_v6 = vpop.f32.mrb[11].mxu0 }
 0x2be   : > { %v1806_v6 = vld [vmem:[#allocation16 + $0x58] sm:$0xff] }
 0x2bf   : > { %v1549_v7 = vsel %vm1234_vm2, %v1546_v5, -inf }
 0x2c0   : > { %1550 = vmax.xlane.f32.xlu1 %v1549_v7  ;;  %v1702_v8 = vpop.f32.mrb[12].mxu0  ;;  %v1823_v7 = vld [vmem:[#allocation16 + $0xe0] sm:$0xff] }
 0x2c1   : > { %v1703_v9 = vadd.f32 %v2221_v58, %v1702_v8  ;;  %v2351_v10 = vpop.f32.mrb[13].mxu0  ;;  %v1819_v58 = vld [vmem:[#allocation16 + $0xc0] sm:$0xff]  ;;  %v1824_v8 = vld [vmem:[#allocation16 + $0xe8] sm:$0xff] }
 0x2c2   : > { %v2421_v61 = vpack.c.bf16 %v1820_v59, %v1819_v58  ;;  %v2429_v10 = vpack.c.bf16 %v1824_v8, %v1823_v7  ;;  %v1854_v59 = vld [vmem:[#allocation16 + $0x1d8] sm:$0xff]  ;;  %v1839_v7 = vld [vmem:[#allocation16 + $0x160] sm:$0xff]  ;;  %v1840_v8 = vld [vmem:[#allocation16 + $0x168] sm:$0xff] }
 0x2c3   : > { %v1706_v11 = vsel %vm1234_vm2, %v1703_v9, -inf }
 0x2c4   : > { %1707 = vmax.xlane.f32.xlu1 %v1706_v11  ;;  %v1807_v11 = vld [vmem:[#allocation16 + $0x60] sm:$0xff] }
 0x345   : > { %v1237_v12 = vpop.xlane.xlu0 %1236 }
 0x346   : > { %v1238_v13 = vsub.f32 %v1231_v60, %v1237_v12  ;;  %v2419_v60 = vpack.c.bf16 %v1802_v57, %v1801_v56  ;;  %v1808_v12 = vld [vmem:[#allocation16 + $0x68] sm:$0xff]  ;;  %v1826_v56 = vld [vmem:[#allocation16 + $0xf8] sm:$0xff]  ;;  %v1853_v57 = vld [vmem:[#allocation16 + $0x1d0] sm:$0xff] }
 0x347   : > { %v2433_v58 = vpack.c.bf16 %v1826_v56, %v1825_v55  ;;  %v2457_v62 = vpack.c.bf16 %v1854_v59, %v1853_v57 }
 0x348   : > { %v1239_v14 = vmul.f32 1.442695, %v1238_v13  ;;  %2420 = vmatpush3.bf16.msra.mxu0 %v2419_v60  ;;  %v2431_v13 = vpack.c.bf16 %v1808_v12, %v1807_v11  ;;  %v1809_v60 = vld [vmem:[#allocation16 + $0x70] sm:$0xff]  ;;  %v1858_v11 = vld [vmem:[#allocation16 + $0x1f8] sm:$0xff] }
 0x349   : > { %v1394_v15 = vpop.xlane.xlu0 %1393  ;;  %2422 = vmatprep.subr.bf16.mxu0 %v2421_v61  ;;  %v1810_v61 = vld [vmem:[#allocation16 + $0x78] sm:$0xff] }
 0x34a   : > { %2588 = vpow2.f32 %v1239_v14  ;;  %v1395_v16 = vsub.f32 %v1389_v1, %v1394_v15  ;;  %v1821_v1 = vld [vmem:[#allocation16 + $0xd0] sm:$0xff]  ;;  %v2435_v63 = vpack.c.bf16 %v1810_v61, %v1809_v60 }
 0x34b   : > { %v2425_v4 = vpack.c.bf16 %v1822_v2, %v1821_v1  ;;  %v1837_v1 = vld [vmem:[#allocation16 + $0x150] sm:$0xff]  ;;  %v1838_v2 = vld [vmem:[#allocation16 + $0x158] sm:$0xff] }
 0x34c   : > { %v1396_v17 = vmul.f32 1.442695, %v1395_v16  ;;  %2424 = vmatpush3.bf16.msra.mxu0 %v2423_v3  ;;  %v2459_v3 = vpack.c.bf16 %v1838_v2, %v1837_v1 }
 0x34d   : > { %v1551_v18 = vpop.xlane.xlu1 %1550  ;;  %2426 = vmatprep.subr.bf16.mxu0 %v2425_v4  ;;  %v1855_v4 = vld [vmem:[#allocation16 + $0x1e0] sm:$0xff] }
 0x34e   : > { %2590 = vpow2.f32 %v1396_v17  ;;  %v1552_v19 = vsub.f32 %v1546_v5, %v1551_v18  ;;  %v1805_v5 = vld [vmem:[#allocation16 + $0x50] sm:$0xff] }
 0x350   : > { %v1553_v20 = vmul.f32 1.442695, %v1552_v19 }
 0x351   : > { %v1708_v21 = vpop.xlane.xlu1 %1707 }
 0x352   : > { %2592 = vpow2.f32 %v1553_v20  ;;  %v1709_v22 = vsub.f32 %v1703_v9, %v1708_v21  ;;  %v2427_v9 = vpack.c.bf16 %v1806_v6, %v1805_v5  ;;  %v1856_v5 = vld [vmem:[#allocation16 + $0x1e8] sm:$0xff] }
 0x353   : > { %v2461_v6 = vpack.c.bf16 %v1856_v5, %v1855_v4 }
 0x354   : > { %v3364_v23 = vpop.eup %2588  ;;  %v1710_v24 = vmul.f32 1.442695, %v1709_v22  ;;  %2428 = vmatpush3.bf16.msra.mxu0 %v2427_v9  ;;  %v1843_v22 = vld [vmem:[#allocation16 + $0x180] sm:$0xff]  ;;  %v2463_v9 = vpack.c.bf16 %v1840_v8, %v1839_v7 }
 0x355   : > { %v1241_v25 = vsel %vm1234_vm2, %v3364_v23, 0.0  ;;  %2430 = vmatprep.subr.bf16.mxu0 %v2429_v10  ;;  %v1857_v10 = vld [vmem:[#allocation16 + $0x1f0] sm:$0xff] }
 0x356   : > { %2594 = vpow2.f32 %v1710_v24  ;;  %1242 = vadd.xlane.f32.xlu0 %v1241_v25  ;;  %v1844_v24 = vld [vmem:[#allocation16 + $0x188] sm:$0xff]  ;;  %v2465_v12 = vpack.c.bf16 %v1858_v11, %v1857_v10 }
 0x358   : > { %v3368_v26 = vpop.eup %2590  ;;  %2432 = vmatpush3.bf16.msra.mxu0 %v2431_v13  ;;  %v1841_v13 = vld [vmem:[#allocation16 + $0x170] sm:$0xff] }
 0x359   : > { %v1398_v27 = vsel %vm1234_vm2, %v3368_v26, 0.0  ;;  %2434 = vmatprep.subr.bf16.mxu0 %v2433_v58 }
 0x35a   : > { %1399 = vadd.xlane.f32.xlu1 %v1398_v27  ;;  %v1827_v27 = vld [vmem:[#allocation16 + $0x100] sm:$0xff] }
 0x35c   : > { %v3372_v28 = vpop.eup %2592  ;;  %2436 = vmatpush3.bf16.msra.mxu0 %v2435_v63 }
 0x35d   : > { %v1555_v29 = vsel %vm1234_vm2, %v3372_v28, 0.0 }
 0x35e   : > { %1556 = vadd.xlane.f32.xlu0 %v1555_v29  ;;  %v1828_v29 = vld [vmem:[#allocation16 + $0x108] sm:$0xff] }
 0x360   : > { %v3376_v30 = vpop.eup %2594 }
 0x361   : > { %v1712_v31 = vsel %vm1234_vm2, %v3376_v30, 0.0 }
 0x362   : > { %1713 = vadd.xlane.f32.xlu1 %v1712_v31  ;;  %v1846_v31 = vld [vmem:[#allocation16 + $0x198] sm:$0xff] }
 0x3e3   : > { %v1243_v14 = vpop.xlane.xlu0 %1242 }
 0x3e4   : > { %2596 = vrcp.f32 %v1243_v14  ;;  %v1842_v14 = vld [vmem:[#allocation16 + $0x178] sm:$0xff] }
 0x3e7   : > { %v1400_v15 = vpop.xlane.xlu1 %1399 }
 0x3e8   : > { %2598 = vrcp.f32 %v1400_v15  ;;  %v2467_v15 = vpack.c.bf16 %v1842_v14, %v1841_v13 }
 0x3eb   : > { %v1557_v16 = vpop.xlane.xlu0 %1556 }
 0x3ec   : > { %2600 = vrcp.f32 %v1557_v16 }
 0x3ee   : > { %v2597_v17 = vpop.eup %2596 }
 0x3ef   : > { %v1245_v18 = vmul.f32 %v2597_v17, %v3364_v23  ;;  %v1714_v19 = vpop.xlane.xlu1 %1713 }
 0x3f0   : > { %2602 = vrcp.f32 %v1714_v19 }
 0x3f1   : > { %2325 = vmatmul.mubr.msk.f32.vlgmr.msra.gmra.mrb[6].mxu1 %vm1234_vm2, %v1245_v18 }
 0x3f2   : > { %v2599_v20 = vpop.eup %2598  ;;  %2333 = vmatpush3.msra.mxu1 %v3337_v34  ;;  %2334 = vmatprep.mubr.msk.f32.mxu1 %vm2914_vm1, %v2913_v0  ;;  %v2437_v34 = vpack.c.bf16 %v1844_v24, %v1843_v22 }
 0x3f3   : > { %v1402_v21 = vmul.f32 %v2599_v20, %v3368_v26  ;;  %2342 = vmatprep.subr.mxu1 %v2913_v0  ;;  %v1845_v26 = vld [vmem:[#allocation16 + $0x190] sm:$0xff] }
 0x3f5   : > { %2335 = vmatmul.mubr.msk.f32.vlgmr.msra.gmra.mrb[8].mxu1 %vm1234_vm2, %v1402_v21 }
 0x3f6   : > { %v2601_v25 = vpop.eup %2600  ;;  %2343 = vmatpush3.msra.mxu1 %v3342_v37  ;;  %2344 = vmatprep.mubr.msk.f32.mxu1 %vm2914_vm1, %v2913_v0  ;;  %v2439_v37 = vpack.c.bf16 %v1828_v29, %v1827_v27  ;;  %v2226_v27 = vld [vmem:[%s3538_s24] ss:$0 sm:$0xff] }
 0x3f7   : > { %v1559_v23 = vmul.f32 %v2601_v25, %v3372_v28  ;;  %2352 = vmatprep.subr.mxu1 %v2913_v0  ;;  %v2441_v28 = vpack.c.bf16 %v1846_v31, %v1845_v26 }
 0x3f9   : > { %2345 = vmatmul.mubr.msk.f32.vlgmr.msra.gmra.mrb[10].mxu1 %vm1234_vm2, %v1559_v23 }
 0x3fa   : > { %v2603_v32 = vpop.eup %2602  ;;  %2353 = vmatpush3.msra.mxu1 %v3345_v40  ;;  %2354 = vmatprep.mubr.msk.f32.mxu1 %vm2914_vm1, %v2913_v0  ;;  %v1832_v40 = vld [vmem:[#allocation16 + $0x128] sm:$0xff] }
 0x3fb   : > { %v1716_v33 = vmul.f32 %v2603_v32, %v3376_v30  ;;  %2438 = vmatprep.subr.bf16.mxu1 %v2437_v34  ;;  %v2447_v0 = vpack.c.bf16 %v1832_v40, %v1831_v43  ;;  %v2449_v30 = vpack.c.bf16 %v1850_v45, %v1849_v44 }
 0x3fd   : > { %2355 = vmatmul.mubr.msk.f32.vlgmr.msra.gmra.mrb[12].mxu1 %vm1234_vm2, %v1716_v33 }
 0x3fe   : > { %2440 = vmatpush3.bf16.msra.mxu1 %v2439_v37 }
 0x3ff   : > { %2442 = vmatprep.subr.bf16.mxu1 %v2441_v28 }
 0x402   : > { %2444 = vmatpush3.bf16.msra.mxu1 %v2443_v41 }
 0x403   : > { %2446 = vmatprep.subr.bf16.mxu1 %v2445_v42 }
 0x406   : > { %2448 = vmatpush3.bf16.msra.mxu1 %v2447_v0 }
 0x407   : > { %2450 = vmatprep.subr.bf16.mxu1 %v2449_v30 }
 0x40a   : > { %2452 = vmatpush3.bf16.msra.mxu1 %v2451_v50 }
 0x40b   : > { %2454 = vmatprep.subr.bf16.mxu1 %v2453_v51 }
 0x40e   : > { %2456 = vmatpush3.bf16.msra.mxu1 %v2455_v54 }
 0x40f   : > { %2458 = vmatprep.subr.bf16.mxu1 %v2457_v62 }
 0x412   : > { %2460 = vmatpush3.bf16.msra.mxu1 %v2459_v3 }
 0x413   : > { %2462 = vmatprep.subr.bf16.mxu1 %v2461_v6 }
 0x416   : > { %2464 = vmatpush3.bf16.msra.mxu1 %v2463_v9 }
 0x417   : > { %2466 = vmatprep.subr.bf16.mxu1 %v2465_v12 }
 0x41a   : > { %2468 = vmatpush3.bf16.msra.mxu1 %v2467_v15 }
 0x4c4   : > { %v1315_v16 = vpop.f32.mrb[6].mxu1 }
 0x4c5   : > { %v2326_v17 = vpop.f32.mrb[7].mxu1 }
 0x4c8   : > { %v1472_v18 = vpop.f32.mrb[8].mxu1 }
 0x4c9   : > { %v2336_v19 = vpop.f32.mrb[9].mxu1  ;;  %1930 = vmatprep.mubr.f32.mxu0 %v1472_v18 }
 0x4ca   : > { %1931 = vmatmul.mubr.f32.vlgmr.msra.gmra.mrb[14].mxu0 %v1315_v16 }
 0x4cc   : > { %v1629_v20 = vpop.f32.mrb[10].mxu1 }
 0x4cd   : > { %v2346_v21 = vpop.f32.mrb[11].mxu1 }
 0x4d0   : > { %v1786_v22 = vpop.f32.mrb[12].mxu1 }
 0x4d1   : > { %v2356_v24 = vpop.f32.mrb[13].mxu1  ;;  %2000 = vmatprep.mubr.f32.mxu1 %v1786_v22 }
 0x4d2   : > { %2001 = vmatmul.mubr.f32.vlgmr.msra.gmra.mrb[14].mxu1 %v1629_v20 }
 0x59d   : > { %v2279_v25 = vpop.f32.mrb[14].mxu0 }
 0x59e   : > { %v2280_v23 = vpop.f32.mrb[15].mxu0 }
 0x59f   : > { %v2281_v34 = vadd.f32 %v2280_v23, %v2279_v25 }
 0x5a1   : > { %v1933_v31 = vadd.f32 %v2281_v34, %v2226_v27 }
 0x5a5   : > { %v2314_v29 = vpop.f32.mrb[14].mxu1 }
 0x5a6   : > { %v2315_v26 = vpop.f32.mrb[15].mxu1 }
 0x5a7   : > { %v2316_v32 = vadd.f32 %v2315_v26, %v2314_v29 }
 0x5a9   : > { %v2003_v37 = vadd.f32 %v2316_v32, %v1933_v31 }
 0x5ab   : > { %2006 = vst [vmem:[%s585_s17] sm:$0xff] %v2003_v37 }
 0x5ac   : > { %2819 = shalt.err (!%p2816_p5)
}
 0x5ad   : > { %s2820_s25 = scalar_lea.hbm %s3407_s11, 128  ;;  %s2824_s14 = scalar_lea.hbm %s3540_s20, 256 }
 0x5ae   : > { %p2821_p3 = scmp.ne.s32.totalorder %s3407_s11, %s2820_s25  ;;  %p2825_p4 = scmp.lt.u32.totalorder %s3407_s11, %s3540_s20 }
 0x5af   : > { %p2826_p10 = scmp.lt.u32.totalorder %s2824_s14, %s2820_s25  ;;  %p2828_p2 = scmp.lt.u32.totalorder %s2820_s25, %s3407_s11 }
 0x5b0   : > { %p2822_p6 = pnand %p2821_p3, %p3541_p1 }
 0x5b1   : > { %p2827_p13 = por %p2826_p10, %p2825_p4 }
 0x5b2   : > { %p2823_p0 = pneg %p2822_p6 }
 0x5b3   : > { %p2829_p12 = por %p2828_p2, %p2827_p13 }
 0x5b5   : > { %p2830_p8 = pnand %p2829_p12, %p2823_p0 }
 0x5b7   : > { %2833 = shalt.err (!%p2830_p8)
}
 0x5b8   : > { %2491 = dma.vmem_to_hbm [thread:$0]  (%p3541_p1), %s3409_s19, 128, %s3407_s11, %s2008_s26  }
 0x5b9 PF: > { %s3542_s8 = sld [smem:[#allocation23_spill]]  ;;  %s3543_s18 = sld [smem:[#allocation30_spill]] }
 0x5ba   : > { %s3544_s1 = sld [smem:[#allocation26_spill]] }
 0x5bf   : > { %s2034_s24 = sand.u32 1, %s3542_s8   ;;  %p3545_p9 = scmp.ne.s32.totalorder %s3543_s18, 0 }
 0x5c0   : > { %p3546_p7 = scmp.ge.s32.totalorder %s3544_s1, 2  ;;  %s2035_s28 = scalar_lea.sflag [#allocation7], %s2034_s24 }
 0x5c2   : > { %p2517_p11 = pnand %p3546_p7, %p3545_p9 }
 0x5c4   : > { %2875 = dma.done.wait (!%p2517_p11), %s2035_s28, 128  }
 0x5c5   : > { %2877 = vsyncadd (!%p2517_p11), %s2035_s28, 4294967168  ;;  %s33_s26 = sadd.s32 1, %s3544_s1   ;;  %s3547_s12 = sld [smem:[#allocation29_spill]] }
 0x5c6   : > { %p30_p5 = scmp.ge.s32.totalorder %s33_s26, 4   ;;  %s3548_s24 = sld [smem:[#allocation25_spill]] }
 0x5c7   : > { %s3549_s25 = sld [smem:[#allocation27_spill]]  ;;  %s3550_s21 = smov %s2884_s22 }
 0x5c8   : > { %s3551_s22 = smov %s2888_s23  ;;  %32 = sbr.rel (!%p30_p5) target bundleno = 18 (0x12), region = 160 }
 0x5cb   : > { %s3552_s23 = smov %s3547_s12 }
 0x5cf   :  { %2040 = vsyncpa [#allocation6], 1 }
 0x5d0   :  { %2042 = vsyncpa [#allocation6 + $0x1], 1 }
 0x5d1   :  { %2043 = vsyncpa [#allocation9], 1 }
 0x5d2   :  { %2045 = vsyncpa [#allocation9 + $0x1], 1 }
 0x5d3   :  { %2046 = vsyncpa [#allocation12], 1 }
 0x5d4   :  { %2047 = vsyncpa [#allocation15], 1 }
 0x5d5   :  { %2048 = vsyncpa [#allocation7], 1 }
 0x5d6   :  { %2050 = vsyncpa [#allocation7 + $0x1], 1 }

</bundles_post_ra>
